<compile_context>
chip_gen: v6e
topology: v6e:2x2x1
jax: 0.10.0
libtpu: 0.0.40
codegen_flags: <defaults>
</compile_context>

<pallas_src>
import jax
import jax.numpy as jnp
from jax.experimental import pallas as pl
from jax.experimental.pallas import tpu as pltpu


# -----------------------------------------------------------------------------
# Kernel 1: per-point MLP (K -> 64 -> 128 -> 1024) + running raw max over N.
# grid = (B, n_split, n_half); axes ("parallel", "parallel", "arbitrary").
# -----------------------------------------------------------------------------
def _point_stage_kernel(x_ref,
                        w1_ref, t1_ref,
                        w2_ref, t2_ref,
                        w3_ref,
                        pooled_ref):
    n = pl.program_id(2)

    x = x_ref[0]                                          # (TILE_N, KP) f32

    # Layer 1: tiny contraction (K zero-padded to 8 lanes), f32. BN scale is
    # folded into w1, so the epilogue is just bias + ReLU.
    h = jnp.dot(x, w1_ref[...], preferred_element_type=jnp.float32)
    h = jnp.maximum(h + t1_ref[...], 0.0)                 # (TILE_N, 64)

    # Layers 2/3: bf16 matmuls with f32 accumulation (BN scales pre-folded).
    h = jnp.dot(h.astype(jnp.bfloat16), w2_ref[...],
                preferred_element_type=jnp.float32)
    h = jnp.maximum(h + t2_ref[...], 0.0)                 # (TILE_N, 128)
    z = jnp.dot(h.astype(jnp.bfloat16), w3_ref[...],
                preferred_element_type=jnp.float32)       # (TILE_N, 1024) raw

    # F.max_pool1d(x, N): running max of the RAW layer-3 pre-activation across
    # the N tiles of this (batch, split) slice.  The bias + ReLU epilogue is
    # applied after the pool (head kernel) — exact, since it is monotone.
    tile_max = jnp.max(z, axis=0, keepdims=True).reshape(pooled_ref.shape)

    @pl.when(n == 0)
    def _():
        pooled_ref[...] = tile_max

    @pl.when(n > 0)
    def _():
        pooled_ref[...] = jnp.maximum(pooled_ref[...], tile_max)


# -----------------------------------------------------------------------------
# Kernel 2: finish the pool + layer-3 epilogue, then the tiny post-pool MLP
# head (1024 -> 512 -> 256 -> K*K) on B rows.
# -----------------------------------------------------------------------------
def _head_kernel(pooled_ref, t3_ref,
                 wm1_ref, tm1_ref,
                 wm2_ref, tm2_ref,
                 wm3_ref, bm3_ref,
                 out_ref):
    z3 = jnp.max(pooled_ref[...], axis=1)                  # (B, 1024) fold split-max
    g = jnp.maximum(z3 + t3_ref[...], 0.0)                 # layer-3 epilogue post-pool
    g = jnp.dot(g.astype(jnp.bfloat16), wm1_ref[...],
                preferred_element_type=jnp.float32)
    g = jnp.maximum(g + tm1_ref[...], 0.0)                 # (B, 512)
    g = jnp.dot(g.astype(jnp.bfloat16), wm2_ref[...],
                preferred_element_type=jnp.float32)
    g = jnp.maximum(g + tm2_ref[...], 0.0)                 # (B, 256)
    # Final Linear(256, K*K); bias already has eye(K).flatten() folded in.
    g = jnp.dot(g, wm3_ref[...], preferred_element_type=jnp.float32)
    out_ref[...] = g + bm3_ref[...]                        # (B, K*K)


# -----------------------------------------------------------------------------
# Wrapper
# -----------------------------------------------------------------------------
def transformer_forward(x, params, K=3, tile_n=1024, vmem_limit_bytes=None):
    """x: (B, K, N) float32 -> (B, K, K) float32 affine transforms."""
    B, Kin, N = x.shape
    assert Kin == K
    assert N % 8 == 0, "number of points must be a multiple of 8"
    KP = params['w1'].shape[0]                 # K padded to 8 lanes

    # --- point tile selection (review item #1): big tiles amortize the per-step
    # pipeline overhead and the MXU weight pushes; snap to a divisor of N.
    tile_n = max(8, min(tile_n, N))
    tile_n -= tile_n % 8
    while N % tile_n:
        tile_n -= 8
    n_tiles = N // tile_n
    # 2-way split of the point axis as an extra parallel grid dim (review #6):
    # lets v7x use both TensorCores even when B == 1; harmless elsewhere.
    n_split = 2 if (n_tiles >= 2 and n_tiles % 2 == 0) else 1
    n_half = n_tiles // n_split

    # --- VMEM limit scaled with the tile, capped v7x-safe (review item #2).
    if vmem_limit_bytes is None:
        vmem_limit_bytes = min(48 * 1024 * 1024,
                               max(32 * 1024 * 1024, 20 * tile_n * 1024))

    # Glue: (B, K, N) -> (B, N, KP) points-major, zero-pad channels to KP.
    # (Kept host-side: the kernel is compute-bound, this single fused pass is
    #  a few percent; see header note on review item #5.)
    x_pts = jnp.transpose(x, (0, 2, 1)).astype(jnp.float32)
    x_pad = jnp.pad(x_pts, ((0, 0), (0, 0), (0, KP - K)))

    point_inputs = (x_pad,
                    params['w1'], params['t1'],
                    params['w2'], params['t2'],
                    params['w3'])

    def const_spec(a):
        nd = a.ndim
        return pl.BlockSpec(a.shape, lambda b, c, n, nd=nd: (0,) * nd)

    flops = 2 * B * N * (KP * 64 + 64 * 128 + 128 * 1024)
    bytes_accessed = int(sum(int(a.size) * a.dtype.itemsize for a in point_inputs)
                         + B * n_split * 1024 * 4)

    pooled3 = pl.pallas_call(
        _point_stage_kernel,
        out_shape=jax.ShapeDtypeStruct((B * n_split, 1, 1024), jnp.float32),
        grid=(B, n_split, n_half),
        in_specs=[pl.BlockSpec((1, tile_n, KP),
                               lambda b, c, n: (b, c * n_half + n, 0))]
                + [const_spec(a) for a in point_inputs[1:]],
        out_specs=pl.BlockSpec((1, 1, 1024),
                               lambda b, c, n: (b * n_split + c, 0, 0)),
        compiler_params=pltpu.CompilerParams(
            dimension_semantics=("parallel", "parallel", "arbitrary"),
            vmem_limit_bytes=vmem_limit_bytes),
        cost_estimate=pl.CostEstimate(flops=flops, transcendentals=0,
                                      bytes_accessed=bytes_accessed),
    )(*point_inputs)

    pooled3 = pooled3.reshape(B, n_split, 1024)

    head_inputs = (pooled3, params['t3'],
                   params['wm1'], params['tm1'],
                   params['wm2'], params['tm2'],
                   params['wm3'], params['bm3'])

    out = pl.pallas_call(
        _head_kernel,
        out_shape=jax.ShapeDtypeStruct((B, K * K), jnp.float32),
    )(*head_inputs)

    return out.reshape(B, K, K)        # == x.view(-1, K, K)


# -----------------------------------------------------------------------------
# Deterministic parameter construction.
# BN (eval mode) is folded exactly into the preceding conv/linear:
#   BN(x @ W + b) = x @ (W * s) + ((b - mean) * s + beta),  s = gamma/sqrt(var+eps)
# The big weights are cast to bf16 once here so the kernel and the reference
# share the same rounding points.
# -----------------------------------------------------------------------------
def make_params(key, K=3):
    eps = 1e-5
    layer_dims = [(K, 64), (64, 128), (128, 1024), (1024, 512), (512, 256)]
    names = ['1', '2', '3', 'm1', 'm2']
    KP = ((K + 7) // 8) * 8
    params = {}
    keys = jax.random.split(key, 6 * len(layer_dims) + 2)
    it = iter(range(len(keys)))
    for (cin, cout), name in zip(layer_dims, names):
        w = jax.random.normal(keys[next(it)], (cin, cout), jnp.float32) * (1.0 / cin ** 0.5)
        b = 0.1 * jax.random.normal(keys[next(it)], (cout,), jnp.float32)
        gamma = 1.0 + 0.1 * jax.random.normal(keys[next(it)], (cout,), jnp.float32)
        beta = 0.1 * jax.random.normal(keys[next(it)], (cout,), jnp.float32)
        mean = 0.05 * jax.random.normal(keys[next(it)], (cout,), jnp.float32)
        var = 1.0 + 0.1 * jax.random.uniform(keys[next(it)], (cout,), jnp.float32)
        s = gamma / jnp.sqrt(var + eps)
        params['w' + name] = w * s[None, :]
        params['t' + name] = ((b - mean) * s + beta)[None, :]
    # bf16 MXU weights (layers 2, 3 and the first two head linears).
    for name in ['2', '3', 'm1', 'm2']:
        params['w' + name] = params['w' + name].astype(jnp.bfloat16)
    # Zero-pad the layer-1 weight rows K -> KP (matches the padded x channels).
    params['w1'] = jnp.pad(params['w1'], ((0, KP - K), (0, 0)))
    # Final Linear(256, K*K); fold bias + identity (x += eye(K).view(-1)).
    wm3 = jax.random.normal(keys[next(it)], (256, K * K), jnp.float32) * (1.0 / 256 ** 0.5)
    bm3 = 0.1 * jax.random.normal(keys[next(it)], (K * K,), jnp.float32)
    identity = jnp.eye(K, dtype=jnp.float32).reshape(-1)
    params['wm3'] = wm3
    params['bm3'] = (bm3 + identity)[None, :]
    return params


# -----------------------------------------------------------------------------
# Pure-JAX reference: same folded params and the same bf16 rounding points,
# but with the module's original op order (layer-3 bias/ReLU BEFORE the pool).
# -----------------------------------------------------------------------------
def transformer_ref(x, params, K=3):
    B, _, N = x.shape
    KP = params['w1'].shape[0]
    hp = jax.lax.Precision.HIGHEST

    def bf16_mm(a, w):
        return jnp.dot(a.astype(jnp.bfloat16), w.astype(jnp.bfloat16),
                       preferred_element_type=jnp.float32)

    h = jnp.transpose(x, (0, 2, 1)).astype(jnp.float32)
    h = jnp.pad(h, ((0, 0), (0, 0), (0, KP - K))).reshape(B * N, KP)
    h = jnp.maximum(jnp.dot(h, params['w1'], precision=hp) + params['t1'], 0.0)
    h = jnp.maximum(bf16_mm(h, params['w2']) + params['t2'], 0.0)
    h = jnp.maximum(bf16_mm(h, params['w3']) + params['t3'], 0.0)
    pooled = jnp.max(h.reshape(B, N, -1), axis=1)
    g = jnp.maximum(bf16_mm(pooled, params['wm1']) + params['tm1'], 0.0)
    g = jnp.maximum(bf16_mm(g, params['wm2']) + params['tm2'], 0.0)
    g = jnp.dot(g, params['wm3'], precision=hp) + params['bm3']
    return g.reshape(B, K, K)


if __name__ == "__main__":
    K, B, N = 3, 2, 512          # B batches of N points with K dims (B x K x N)
    root = jax.random.PRNGKey(0)
    pkey, xkey = jax.random.split(root)
    params = make_params(pkey, K=K)
    x = jax.random.normal(xkey, (B, K, N), dtype=jnp.float32)

    ref = jax.block_until_ready(transformer_ref(x, params, K=K))

    # Small tile: grid (B, 2, 2) exercises the 2-way point split, the running
    # max across tiles, and the post-pool epilogue.
    out_small = jax.block_until_ready(transformer_forward(x, params, K=K, tile_n=128))
    # Default tile (clamped to N): single tile per (batch, split) slice.
    out_big = jax.block_until_ready(transformer_forward(x, params, K=K))

    for out in (out_small, out_big):
        assert out.shape == (B, K, K), out.shape
        max_err = float(jnp.max(jnp.abs(out - ref)))
        assert jnp.allclose(out, ref, rtol=1e-2, atol=1e-2), max_err
    print("KERNEL_OK")
</pallas_src>

<mosaic_0001>
module attributes {stable_mosaic.version = 11 : i64} {
  func.func @_point_stage_kernel(%arg0: i32, %arg1: i32, %arg2: i32, %arg3: memref<1x128x8xf32, #tpu.memory_space<vmem>>, %arg4: memref<8x64xf32, #tpu.memory_space<vmem>>, %arg5: memref<1x64xf32, #tpu.memory_space<vmem>>, %arg6: memref<64x128xbf16, #tpu.memory_space<vmem>>, %arg7: memref<1x128xf32, #tpu.memory_space<vmem>>, %arg8: memref<128x1024xbf16, #tpu.memory_space<vmem>>, %arg9: memref<1x1x1024xf32, #tpu.memory_space<vmem>>) attributes {dimension_semantics = [#tpu.dimension_semantics<parallel>, #tpu.dimension_semantics<parallel>, #tpu.dimension_semantics<arbitrary>], iteration_bounds = array<i64: 2, 2, 2>, scalar_prefetch = 0 : i64, scratch_operands = 0 : i64, tpu.core_type = #tpu.core_type<tc>, window_params = [{transform_indices = @transform_0, window_bounds = array<i64: 1, 128, 8>}, {pipeline_mode = #tpu.pipeline_mode<synchronous>, transform_indices = @transform_1, window_bounds = array<i64: 8, 64>}, {pipeline_mode = #tpu.pipeline_mode<synchronous>, transform_indices = @transform_2, window_bounds = array<i64: 1, 64>}, {pipeline_mode = #tpu.pipeline_mode<synchronous>, transform_indices = @transform_3, window_bounds = array<i64: 64, 128>}, {pipeline_mode = #tpu.pipeline_mode<synchronous>, transform_indices = @transform_4, window_bounds = array<i64: 1, 128>}, {pipeline_mode = #tpu.pipeline_mode<synchronous>, transform_indices = @transform_5, window_bounds = array<i64: 128, 1024>}, {transform_indices = @transform_6, window_bounds = array<i64: 1, 1, 1024>}]} {
    %c0 = arith.constant 0 : index
    %c0_0 = arith.constant 0 : index
    %c0_1 = arith.constant 0 : index
    %0 = vector.load %arg3[%c0, %c0_0, %c0_1] : memref<1x128x8xf32, #tpu.memory_space<vmem>>, vector<1x128x8xf32>
    %1 = vector.shape_cast %0 : vector<1x128x8xf32> to vector<128x8xf32>
    %c0_2 = arith.constant 0 : index
    %c0_3 = arith.constant 0 : index
    %2 = vector.load %arg4[%c0_2, %c0_3] : memref<8x64xf32, #tpu.memory_space<vmem>>, vector<8x64xf32>
    %cst = arith.constant dense<0.000000e+00> : vector<128x64xf32>
    %3 = tpu.matmul %1, %2, %cst {dimension_numbers = #tpu.dot_dimension_numbers<[1], [0], [0], [1], [0, 0, 1, 1], [], []>} : vector<128x8xf32>, vector<8x64xf32>, vector<128x64xf32> -> vector<128x64xf32>
    %c0_4 = arith.constant 0 : index
    %c0_5 = arith.constant 0 : index
    %4 = vector.load %arg5[%c0_4, %c0_5] : memref<1x64xf32, #tpu.memory_space<vmem>>, vector<1x64xf32>
    %5 = vector.broadcast %4 : vector<1x64xf32> to vector<128x64xf32>
    %6 = arith.addf %3, %5 : vector<128x64xf32>
    %cst_6 = arith.constant 0.000000e+00 : f32
    %7 = vector.broadcast %cst_6 : f32 to vector<128x64xf32>
    %8 = arith.maximumf %6, %7 : vector<128x64xf32>
    %9 = arith.truncf %8 : vector<128x64xf32> to vector<128x64xbf16>
    %c0_7 = arith.constant 0 : index
    %c0_8 = arith.constant 0 : index
    %10 = vector.load %arg6[%c0_7, %c0_8] : memref<64x128xbf16, #tpu.memory_space<vmem>>, vector<64x128xbf16>
    %cst_9 = arith.constant dense<0.000000e+00> : vector<128x128xf32>
    %11 = tpu.matmul %9, %10, %cst_9 {dimension_numbers = #tpu.dot_dimension_numbers<[1], [0], [0], [1], [0, 0, 1, 1], [], []>} : vector<128x64xbf16>, vector<64x128xbf16>, vector<128x128xf32> -> vector<128x128xf32>
    %c0_10 = arith.constant 0 : index
    %c0_11 = arith.constant 0 : index
    %12 = vector.load %arg7[%c0_10, %c0_11] : memref<1x128xf32, #tpu.memory_space<vmem>>, vector<1x128xf32>
    %13 = vector.broadcast %12 : vector<1x128xf32> to vector<128x128xf32>
    %14 = arith.addf %11, %13 : vector<128x128xf32>
    %cst_12 = arith.constant 0.000000e+00 : f32
    %15 = vector.broadcast %cst_12 : f32 to vector<128x128xf32>
    %16 = arith.maximumf %14, %15 : vector<128x128xf32>
    %17 = arith.truncf %16 : vector<128x128xf32> to vector<128x128xbf16>
    %c0_13 = arith.constant 0 : index
    %c0_14 = arith.constant 0 : index
    %18 = vector.load %arg8[%c0_13, %c0_14] : memref<128x1024xbf16, #tpu.memory_space<vmem>>, vector<128x1024xbf16>
    %cst_15 = arith.constant dense<0.000000e+00> : vector<128x1024xf32>
    %19 = tpu.matmul %17, %18, %cst_15 {dimension_numbers = #tpu.dot_dimension_numbers<[1], [0], [0], [1], [0, 0, 1, 1], [], []>} : vector<128x128xbf16>, vector<128x1024xbf16>, vector<128x1024xf32> -> vector<128x1024xf32>
    %cst_16 = arith.constant dense<0xFF800000> : vector<1024xf32>
    %20 = vector.multi_reduction <maximumf>, %19, %cst_16 [0] : vector<128x1024xf32> to vector<1024xf32>
    %21 = vector.shape_cast %20 : vector<1024xf32> to vector<1x1024xf32>
    %22 = vector.shape_cast %21 : vector<1x1024xf32> to vector<1x1x1024xf32>
    %c0_i32 = arith.constant 0 : i32
    %23 = arith.cmpi eq, %arg2, %c0_i32 : i32
    %24 = arith.extui %23 : i1 to i32
    %c0_i32_17 = arith.constant 0 : i32
    %25 = arith.cmpi ne, %24, %c0_i32_17 : i32
    scf.if %25 {
      %c0_20 = arith.constant 0 : index
      %c0_21 = arith.constant 0 : index
      %c0_22 = arith.constant 0 : index
      %29 = vector.load %arg9[%c0_20, %c0_21, %c0_22] : memref<1x1x1024xf32, #tpu.memory_space<vmem>>, vector<1x1x1024xf32>
      tpu.vector_store %arg9[%c0_20, %c0_21, %c0_22], %22 {strides = array<i32>} : memref<1x1x1024xf32, #tpu.memory_space<vmem>>, vector<1x1x1024xf32>,
    } else {
    }
    %c0_i32_18 = arith.constant 0 : i32
    %26 = arith.cmpi sgt, %arg2, %c0_i32_18 : i32
    %27 = arith.extui %26 : i1 to i32
    %c0_i32_19 = arith.constant 0 : i32
    %28 = arith.cmpi ne, %27, %c0_i32_19 : i32
    scf.if %28 {
      %c0_20 = arith.constant 0 : index
      %c0_21 = arith.constant 0 : index
      %c0_22 = arith.constant 0 : index
      %29 = vector.load %arg9[%c0_20, %c0_21, %c0_22] : memref<1x1x1024xf32, #tpu.memory_space<vmem>>, vector<1x1x1024xf32>
      %30 = arith.maximumf %29, %22 : vector<1x1x1024xf32>
      %c0_23 = arith.constant 0 : index
      %c0_24 = arith.constant 0 : index
      %c0_25 = arith.constant 0 : index
      %31 = vector.load %arg9[%c0_23, %c0_24, %c0_25] : memref<1x1x1024xf32, #tpu.memory_space<vmem>>, vector<1x1x1024xf32>
      tpu.vector_store %arg9[%c0_23, %c0_24, %c0_25], %30 {strides = array<i32>} : memref<1x1x1024xf32, #tpu.memory_space<vmem>>, vector<1x1x1024xf32>,
    } else {
    }
    return
  }
  func.func @transform_0(%arg0: i32, %arg1: i32, %arg2: i32) -> (i32, i32, i32) {
    %c2_i32 = arith.constant 2 : i32
    %0 = arith.muli %arg1, %c2_i32 : i32
    %1 = arith.addi %0, %arg2 : i32
    %c0_i32 = arith.constant 0 : i32
    %c0_i32_0 = arith.constant 0 : i32
    return %arg0, %1, %c0_i32 : i32, i32, i32
  }
  func.func @transform_1(%arg0: i32, %arg1: i32, %arg2: i32) -> (i32, i32) {
    %c0_i32 = arith.constant 0 : i32
    %c0_i32_0 = arith.constant 0 : i32
    %c0_i32_1 = arith.constant 0 : i32
    return %c0_i32, %c0_i32_0 : i32, i32
  }
  func.func @transform_2(%arg0: i32, %arg1: i32, %arg2: i32) -> (i32, i32) {
    %c0_i32 = arith.constant 0 : i32
    %c0_i32_0 = arith.constant 0 : i32
    %c0_i32_1 = arith.constant 0 : i32
    return %c0_i32, %c0_i32_0 : i32, i32
  }
  func.func @transform_3(%arg0: i32, %arg1: i32, %arg2: i32) -> (i32, i32) {
    %c0_i32 = arith.constant 0 : i32
    %c0_i32_0 = arith.constant 0 : i32
    %c0_i32_1 = arith.constant 0 : i32
    return %c0_i32, %c0_i32_0 : i32, i32
  }
  func.func @transform_4(%arg0: i32, %arg1: i32, %arg2: i32) -> (i32, i32) {
    %c0_i32 = arith.constant 0 : i32
    %c0_i32_0 = arith.constant 0 : i32
    %c0_i32_1 = arith.constant 0 : i32
    return %c0_i32, %c0_i32_0 : i32, i32
  }
  func.func @transform_5(%arg0: i32, %arg1: i32, %arg2: i32) -> (i32, i32) {
    %c0_i32 = arith.constant 0 : i32
    %c0_i32_0 = arith.constant 0 : i32
    %c0_i32_1 = arith.constant 0 : i32
    return %c0_i32, %c0_i32_0 : i32, i32
  }
  func.func @transform_6(%arg0: i32, %arg1: i32, %arg2: i32) -> (i32, i32, i32) {
    %c2_i32 = arith.constant 2 : i32
    %0 = arith.muli %arg0, %c2_i32 : i32
    %1 = arith.addi %0, %arg1 : i32
    %c0_i32 = arith.constant 0 : i32
    %c0_i32_0 = arith.constant 0 : i32
    %c0_i32_1 = arith.constant 0 : i32
    return %1, %c0_i32, %c0_i32_0 : i32, i32, i32
  }
}

</mosaic_0001>

<bundles_post_ra>
// kernel: tpu_custom_call.1
= control target key start
LH: loop header
LB: loop body
LE: loop exit
PB: predicated region body
PF: predicated region fallthrough
CT: control target
= control target key end

     0   :  { %s2946_s0 = inlined_call_operand.vmem [shape: f32[2,512,8], index: 0, kind: input, shape index: {}]   ;;  %s2947_s1 = inlined_call_operand.vmem [shape: f32[8,64], index: 1, kind: input, shape index: {}]   ;;  %s2948_s2 = inlined_call_operand.vmem [shape: f32[1,64], index: 2, kind: input, shape index: {}]   ;;  %s2949_s3 = inlined_call_operand.vmem [shape: bf16[64,128], index: 3, kind: input, shape index: {}]   ;;  %s2950_s4 = inlined_call_operand.vmem [shape: f32[1,128], index: 4, kind: input, shape index: {}]   ;;  %s2951_s5 = inlined_call_operand.vmem [shape: bf16[128,1024], index: 5, kind: input, shape index: {}]   ;;  %s2952_s6 = inlined_call_operand.hbm [shape: f32[4,1,1024], index: 6, kind: output, shape index: {}]  }
   0x1   :  { %2956 = sst [smem:[#allocation8_spill]] %s2946_s0 }
   0x2   :  { %2957 = sst [smem:[#allocation9_spill]] %s2947_s1 }
   0x3   :  { %11 = vsyncpa [#allocation3], 0 }
   0x4   :  { %13 = vsyncpa [#allocation3 + $0x1], 0  ;;  %s2405_s21 = smov 0   ;;  %s2407_s22 = smov 0  }
   0x5   :  { %s2409_s23 = smov 0   ;;  %s2411_s24 = smov 0  }
   0x6   :  { %s2413_s25 = smov 0   ;;  %s2415_s26 = smov 0  }
   0x7   :  { %s2417_s27 = smov 0   ;;  %s2419_s28 = smov 0  }
   0x8   :  { %s2421_s29 = smov 0   ;;  %s2423_s30 = smov 0  }
   0x9 LB: > { %s1966_s7 = sadd.s32 4294967295, %s2364_s30   ;;  %s31_s8 = sadd.s32 1, %s2352_s27  ;;  %s2364_s30 = sphi %s2423_s30, %s19_s30   ;;  %s2360_s29 = sphi %s2421_s29, %s2977_s29   ;;  %s2356_s28 = sphi %s2419_s28, %s2976_s28   ;;  %s2352_s27 = sphi %s2417_s27, %s2975_s27   ;;  %s2348_s26 = sphi %s2415_s26, %s2974_s26   ;;  %s2344_s25 = sphi %s2413_s25, %s2973_s25   ;;  %s2340_s24 = sphi %s2411_s24, %s2972_s24   ;;  %s2336_s23 = sphi %s2409_s23, %s2971_s23   ;;  %s2332_s22 = sphi %s2407_s22, %s2970_s22   ;;  %s2328_s21 = sphi %s2405_s21, %s2969_s21  }
   0xa   : > { %p32_p0 = scmp.ge.s32.totalorder %s31_s8, 2  ;;  %s34_s9 = sadd.s32 1, %s2356_s28 }
   0xb   : > { %s1967_s10 = sadd.s32 4294967294, %s2364_s30   ;;  %s38_s11 = sadd.s32 1, %s2360_s29 }
   0xc   : > { %s2979_s8 = smov (%p32_p0, %s31_s8), 0  ;;  %s2981_s9 = smov (!%p32_p0, %s34_s9), %s2356_s28 }
   0xd   : > { %2958 = sst [smem:[#allocation5_spill]] %s2979_s8  ;;  %s1970_s12 = sshll.u32 %s2360_s29, 1 }
   0xe   : > { %p196_p1 = scmp.ne.s32.totalorder %s2336_s23, %s2332_s22  ;;  %p36_p2 = scmp.ge.s32.totalorder %s2981_s9, 2 }
   0xf   : > { %p197_p3 = scmp.eq.s32.totalorder %s1966_s7, 7  ;;  %p202_p4 = scmp.ne.s32.totalorder %s2332_s22, %s2328_s21 }
  0x10   : > { %p203_p5 = scmp.eq.s32.totalorder %s1967_s10, 7  ;;  %s2983_s9 = smov (%p36_p2, %s2981_s9), 0 }
  0x11   : > { %2959 = sst [smem:[#allocation6_spill]] %s2983_s9  ;;  %s2985_s11 = smov (!%p36_p2, %s38_s11), %s2360_s29 }
  0x12   : > { %p2471_p6 = por %p197_p3, %p196_p1  ;;  %p2475_p7 = por %p203_p5, %p202_p4 }
  0x13   : > { %p40_p8 = scmp.ge.s32.totalorder %s2985_s11, 2  ;;  %p1974_p9 = scmp.ge.s32.totalorder %s2364_s30, 1 }
  0x14   : > { %p253_p10 = scmp.lt.s32.totalorder %s2364_s30, 9  ;;  %s180_s15 = sadd.s32 %s2356_s28, %s1970_s12 }
  0x15   : > { %s2987_s11 = smov (%p40_p8, %s2985_s11), 0  ;;  %s186_s19 = sadd.s32 1, %s2336_s23 }
  0x16   : > { %2962 = sst [smem:[#allocation7_spill]] %s2987_s11  ;;  %p254_p11 = pnand %p1974_p9, %p253_p10 }
  0x17   : > { %s1971_s16 = sshll.u32 %s2987_s11, 1  ;;  %s2954_s7 = sand.u32 (!%p254_p11), 1, %s2332_s22  }
  0x18   : > { %s182_s17 = sadd.s32 %s1971_s16, %s2983_s9  ;;  %257 = sbr.rel (%p254_p11) target bundleno = 847 (0x34f), region = 44 }
  0x19   : > { %s183_s18 = ssub.s32 %s180_s15, %s182_s17  ;;  %s2963_s1 = sld [smem:[#allocation9_spill]] (!%p254_p11) }
  0x1a   : > { %p184_p12 = scmp.eq.s32.totalorder %s183_s18, 0  ;;  %s1976_s12 = sshll.u32 (!%p254_p11), %s2344_s25, 1 }
  0x1b   : > { %s2497_s16 = sshll.u32 (!%p254_p11), %s2954_s7, 3  ;;  %s290_s15 = sadd.s32 (!%p254_p11), %s2340_s24, %s1976_s12 }
  0x1c   : > { %s2488_s20 = scalar_select %p184_p12, %s2336_s23, %s186_s19  }
  0x1d   : > { %v2252_v1 = vld [vmem:[%s2949_s3 + $0x18] sm:$0xff]   ;;  %s1977_s19 = sshll.u32 %s290_s15, 4  ;;  %p292_p13 = scmp.lt.s32.totalorder %s2348_s26, 1  ;;  %vm330_vm0 = vcmask 64512   ;;  %v2253_v18 = vld [vmem:[%s2949_s3 + $0x10] sm:$0xff]   ;;  %v2254_v19 = vld [vmem:[%s2949_s3 + $0x8] sm:$0xff]  }
  0x1e   : > { %p294_p0 = scmp.lt.s32.totalorder %s1977_s19, 63  ;;  %2138 = vmatprep.subr.bf16.mxu1 %v2252_v1  ;;  %s2964_s0 = sld [smem:[#allocation8_spill]]  ;;  %v2255_v20 = vld [vmem:[%s2949_s3] sm:$0xff]   ;;  %v2560_v23 = vld [vmem:[%s2951_s5 + $0x1c8] sm:$0xff]  ;;  %vm587_vm1 = vcmask 523264  }
  0x1f   : > { %v322_v0 = vld [vmem:[%s2963_s1] sm:$0xff]  ;;  %2139 = vmatpush3.bf16.msra.mxu1 %v2252_v1  ;;  %s293_s11 = scalar_select %p292_p13, %s2348_s26, 1  ;;  %v794_v26 = vld [vmem:[%s2951_s5 + $0x1e8] sm:$0xff] }
  0x20   : > { %2112 = vmatprep.subr.mxu0 %v322_v0  ;;  %s2989_s19 = smov (!%p294_p0, %s1977_s19), 63  ;;  %2140 = vmatprep.subr.bf16.mxu1 %v2253_v18  ;;  %v789_v21 = vld [vmem:[%s2951_s5 + $0x1c0] sm:$0xff]  ;;  %v2068_v29 = vcombine.low %v2560_v23, %v794_v26  ;;  %v2069_v30 = vcombine.high %v2560_v23, %v794_v26  ;;  %v782_v58 = vld [vmem:[%s2951_s5 + $0x188] sm:$0xff]  ;;  %s2877_s18 = scalar_lea.vmem [#allocation2], %s2497_s16 }
  0x21   : > { %2113 = vmatpush3.msra.mxu0 %v322_v0  ;;  %s1978_s8 = sshll.u32 %s293_s11, 6  ;;  %v793_v22 = vld [vmem:[%s2951_s5 + $0x1e0] sm:$0xff]  ;;  %v786_v59 = vld [vmem:[%s2951_s5 + $0x1a8] sm:$0xff]  ;;  %p2074_p1 = scmp.ne.s32.totalorder %s2340_s24, 0 }
  0x22   : > { %s297_s10 = sadd.s32 %s1978_s8, %s2989_s19  ;;  %v2066_v24 = vcombine.low %v789_v21, %v793_v22  ;;  %v2067_v25 = vcombine.high %v789_v21, %v793_v22  ;;  %v781_v27 = vld [vmem:[%s2951_s5 + $0x180] sm:$0xff] }
  0x23   : > { %s1979_s1 = sshll.u32 %s297_s10, 3  ;;  %2141 = vmatpush3.bf16.msra.mxu1 %v2253_v18  ;;  %v785_v28 = vld [vmem:[%s2951_s5 + $0x1a0] sm:$0xff] }
  0x24   : > { %s2508_s12 = scalar_lea.vmem %s2964_s0, %s1979_s1  ;;  %2142 = vmatprep.subr.bf16.mxu1 %v2254_v19  ;;  %v2059_v31 = vcombine.high %v781_v27, %v785_v28  ;;  %v773_v32 = vld [vmem:[%s2951_s5 + $0x140] sm:$0xff]  ;;  %1117 = vmatprep.subr.bf16.mxu0 %v2067_v25  ;;  %v2058_v34 = vcombine.low %v781_v27, %v785_v28  ;;  %v758_v27 = vld [vmem:[%s2951_s5 + $0xc8] sm:$0xff] }
  0x25   : > { %v306_v2 = vld [vmem:[%s2508_s12] sm:$0xff]  ;;  %v307_v3 = vld [vmem:[%s2508_s12 + $0x8] sm:$0xff]  ;;  %v308_v4 = vld [vmem:[%s2508_s12 + $0x10] sm:$0xff] }
  0x26   : > { %2114 = vmatprep.mubr.msk.f32.mxu0 %vm330_vm0, %v306_v2  ;;  %v309_v5 = vld [vmem:[%s2508_s12 + $0x18] sm:$0xff]  ;;  %v310_v6 = vld [vmem:[%s2508_s12 + $0x20] sm:$0xff]  ;;  %v311_v7 = vld [vmem:[%s2508_s12 + $0x28] sm:$0xff] }
  0x27   : > { %2115 = vmatmul.mubr.msk.f32.vlgmr.msra.gmra.mxu0 %vm330_vm0, %v307_v3  ;;  %v312_v8 = vld [vmem:[%s2508_s12 + $0x30] sm:$0xff]  ;;  %v313_v9 = vld [vmem:[%s2508_s12 + $0x38] sm:$0xff]  ;;  %v314_v10 = vld [vmem:[%s2508_s12 + $0x40] sm:$0xff]  ;;  %2143 = vmatpush3.bf16.msra.mxu1 %v2254_v19  ;;  %v2061_v3 = vcombine.high %v782_v58, %v786_v59 }
  0x28   : > { %2117 = vmatprep.mubr.msk.f32.mxu0 %vm330_vm0, %v308_v4  ;;  %v315_v11 = vld [vmem:[%s2508_s12 + $0x48] sm:$0xff]  ;;  %v316_v12 = vld [vmem:[%s2508_s12 + $0x50] sm:$0xff]  ;;  %v317_v13 = vld [vmem:[%s2508_s12 + $0x58] sm:$0xff]  ;;  %2144 = vmatprep.subr.bf16.mxu1 %v2255_v20 }
  0x29   : > { %v318_v14 = vld [vmem:[%s2508_s12 + $0x60] sm:$0xff]  ;;  %v319_v15 = vld [vmem:[%s2508_s12 + $0x68] sm:$0xff]  ;;  %v320_v16 = vld [vmem:[%s2508_s12 + $0x70] sm:$0xff]  ;;  %1118 = vmatpush1.bf16.msra.mxu0 %v2066_v24 }
  0x2a   : > { %v321_v17 = vld [vmem:[%s2508_s12 + $0x78] sm:$0xff]  ;;  %v777_v33 = vld [vmem:[%s2951_s5 + $0x160] sm:$0xff]  ;;  %1119 = vmatprep.subr.bf16.mxu0 %v2059_v31  ;;  %v762_v28 = vld [vmem:[%s2951_s5 + $0xe8] sm:$0xff] }
  0x2b   : > { %2118 = vmatmul.mubr.msk.f32.gmra.mxu0 %vm330_vm0, %v309_v5  ;;  %2145 = vmatpush3.bf16.msra.mxu1 %v2255_v20  ;;  %v2051_v35 = vcombine.high %v773_v32, %v777_v33  ;;  %v765_v36 = vld [vmem:[%s2951_s5 + $0x100] sm:$0xff]  ;;  %v2050_v38 = vcombine.low %v773_v32, %v777_v33  ;;  %v774_v5 = vld [vmem:[%s2951_s5 + $0x148] sm:$0xff] }
  0x2c   : > { %2120 = vmatprep.mubr.msk.f32.mxu0 %vm330_vm0, %v310_v6  ;;  %1230 = vmatprep.subr.bf16.mxu1 %v2069_v30  ;;  %v769_v37 = vld [vmem:[%s2951_s5 + $0x120] sm:$0xff]  ;;  %v778_v6 = vld [vmem:[%s2951_s5 + $0x168] sm:$0xff] }
  0x2d   : > { %1120 = vmatpush1.bf16.msra.mxu0 %v2058_v34  ;;  %v2043_v39 = vcombine.high %v765_v36, %v769_v37  ;;  %v757_v40 = vld [vmem:[%s2951_s5 + $0xc0] sm:$0xff]  ;;  %v2042_v42 = vcombine.low %v765_v36, %v769_v37  ;;  %v2052_v21 = vcombine.low %v774_v5, %v778_v6  ;;  %v2037_v36 = vcombine.high %v758_v27, %v762_v28 }
  0x2e   : > { %1121 = vmatprep.subr.bf16.mxu0 %v2051_v35  ;;  %v761_v41 = vld [vmem:[%s2951_s5 + $0xe0] sm:$0xff] }
  0x2f   : > { %2121 = vmatmul.mubr.msk.f32.gmra.mxu0 %vm330_vm0, %v311_v7  ;;  %v2035_v43 = vcombine.high %v757_v40, %v761_v41  ;;  %v2034_v44 = vcombine.low %v757_v40, %v761_v41  ;;  %v2594_v45 = vld [vmem:[%s2948_s2] ss:$0 sm:$0xff]  ;;  %v2036_v41 = vcombine.low %v758_v27, %v762_v28 }
  0x30   : > { %2123 = vmatprep.mubr.msk.f32.mxu0 %vm330_vm0, %v312_v8 }
  0x31   : > { %1122 = vmatpush1.bf16.msra.mxu0 %v2050_v38 }
  0x32   : > { %1123 = vmatprep.subr.bf16.mxu0 %v2043_v39 }
  0x33   : > { %2124 = vmatmul.mubr.msk.f32.gmra.mxu0 %vm330_vm0, %v313_v9 }
  0x34   : > { %2126 = vmatprep.mubr.msk.f32.mxu0 %vm330_vm0, %v314_v10  ;;  %v2060_v10 = vcombine.low %v782_v58, %v786_v59 }
  0x35   : > { %1124 = vmatpush1.bf16.msra.mxu0 %v2042_v42 }
  0x36   : > { %1125 = vmatprep.subr.bf16.mxu0 %v2035_v43 }
  0x37   : > { %2127 = vmatmul.mubr.msk.f32.gmra.mxu0 %vm330_vm0, %v315_v11 }
  0x38   : > { %2129 = vmatprep.mubr.msk.f32.mxu0 %vm330_vm0, %v316_v12 }
  0x39   : > { %1126 = vmatpush1.bf16.msra.mxu0 %v2034_v44 }
  0x3b   : > { %2130 = vmatmul.mubr.msk.f32.gmra.mxu0 %vm330_vm0, %v317_v13 }
  0x3c   : > { %2132 = vmatprep.mubr.msk.f32.mxu0 %vm330_vm0, %v318_v14  ;;  %v2053_v14 = vcombine.high %v774_v5, %v778_v6  ;;  %v733_v6 = vld [vmem:[%s2951_s5] sm:$0xff] }
  0x3f   : > { %2133 = vmatmul.mubr.msk.f32.gmra.mxu0 %vm330_vm0, %v319_v15 }
  0x40   : > { %2135 = vmatprep.mubr.msk.f32.mxu0 %vm330_vm0, %v320_v16  ;;  %v766_v16 = vld [vmem:[%s2951_s5 + $0x108] sm:$0xff] }
  0x43   : > { %2136 = vmatmul.mubr.msk.f32.gmra.mxu0 %vm330_vm0, %v321_v17  ;;  %v770_v17 = vld [vmem:[%s2951_s5 + $0x128] sm:$0xff] }
  0x44   : > { %v2045_v25 = vcombine.high %v766_v16, %v770_v17  ;;  %v2044_v32 = vcombine.low %v766_v16, %v770_v17  ;;  %v795_v16 = vld [vmem:[%s2951_s5 + $0x1f0] sm:$0xff]  ;;  %v792_v17 = vld [vmem:[%s2951_s5 + $0x1d8] sm:$0xff] }
  0xe7   : > { %v2116_v46 = vpop.f32.mrf.mxu0 }
  0xe8   : > { %v451_v47 = vadd.f32 %v2116_v46, %v2594_v45 }
  0xe9   : > { %v445_v48 = vpop.f32.mrf.mxu0 }
  0xea   : > { %v446_v49 = vadd.f32 %v2594_v45, %v445_v48  ;;  %v525_v51 = vmax.f32 %v451_v47, 0.0 }
  0xeb   : > { %v2119_v50 = vpop.f32.mrf.mxu0 }
  0xec   : > { %v524_v52 = vmax.f32 %v446_v49, 0.0  ;;  %v461_v53 = vadd.f32 %v2119_v50, %v2594_v45 }
  0xed   : > { %v455_v54 = vpop.f32.mrf.mxu0 }
  0xee   : > { %v456_v55 = vadd.f32 %v2594_v45, %v455_v54  ;;  %v540_v56 = vpack.c.bf16 %v525_v51, %v524_v52  ;;  %v527_v60 = vmax.f32 %v461_v53, 0.0 }
  0xef   : > { %v2122_v57 = vpop.f32.mrf.mxu0 }
  0xf0   : > { %v526_v61 = vmax.f32 %v456_v55, 0.0  ;;  %v471_v62 = vadd.f32 %v2122_v57, %v2594_v45  ;;  %2146 = vmatprep.mubr.msk.bf16.mxu1 %vm587_vm1, %v540_v56  ;;  %v749_v55 = vld [vmem:[%s2951_s5 + $0x80] sm:$0xff]  ;;  %v750_v57 = vld [vmem:[%s2951_s5 + $0x88] sm:$0xff] }
  0xf1   : > { %v465_v63 = vpop.f32.mrf.mxu0  ;;  %v753_v56 = vld [vmem:[%s2951_s5 + $0xa0] sm:$0xff] }
  0xf2   : > { %v541_v0 = vpack.c.bf16 %v527_v60, %v526_v61  ;;  %v529_v1 = vmax.f32 %v471_v62, 0.0  ;;  %v466_v2 = vadd.f32 %v2594_v45, %v465_v63  ;;  %v2027_v58 = vcombine.high %v749_v55, %v753_v56  ;;  %v741_v62 = vld [vmem:[%s2951_s5 + $0x40] sm:$0xff] }
  0xf3   : > { %v2125_v4 = vpop.f32.mrf.mxu0  ;;  %v2026_v59 = vcombine.low %v749_v55, %v753_v56  ;;  %v745_v63 = vld [vmem:[%s2951_s5 + $0x60] sm:$0xff]  ;;  %v767_v55 = vld [vmem:[%s2951_s5 + $0x110] sm:$0xff] }
  0xf4   : > { %v528_v7 = vmax.f32 %v466_v2, 0.0  ;;  %v481_v8 = vadd.f32 %v2125_v4, %v2594_v45  ;;  %2147 = vmatmul.mubr.msk.bf16.vlgmr.msra.gmra.mxu1 %vm587_vm1, %v541_v0  ;;  %1127 = vmatprep.subr.bf16.mxu0 %v2027_v58  ;;  %v742_v0 = vld [vmem:[%s2951_s5 + $0x48] sm:$0xff]  ;;  %v768_v58 = vld [vmem:[%s2951_s5 + $0x118] sm:$0xff] }
  0xf5   : > { %v475_v9 = vpop.f32.mrf.mxu0  ;;  %1231 = vmatpush1.bf16.msra.mxu1 %v2068_v29  ;;  %1128 = vmatpush1.bf16.msra.mxu0 %v2026_v59  ;;  %v746_v2 = vld [vmem:[%s2951_s5 + $0x68] sm:$0xff] }
  0xf6   : > { %v542_v11 = vpack.c.bf16 %v529_v1, %v528_v7  ;;  %v531_v12 = vmax.f32 %v481_v8, 0.0  ;;  %v476_v13 = vadd.f32 %v2594_v45, %v475_v9  ;;  %1232 = vmatprep.subr.bf16.mxu1 %v2061_v3  ;;  %v2019_v1 = vcombine.high %v741_v62, %v745_v63  ;;  %v737_v7 = vld [vmem:[%s2951_s5 + $0x20] sm:$0xff]  ;;  %v734_v8 = vld [vmem:[%s2951_s5 + $0x8] sm:$0xff] }
  0xf7   : > { %v2128_v15 = vpop.f32.mrf.mxu0  ;;  %v2018_v3 = vcombine.low %v741_v62, %v745_v63  ;;  %v2020_v4 = vcombine.low %v742_v0, %v746_v2  ;;  %v2021_v5 = vcombine.high %v742_v0, %v746_v2  ;;  %v2011_v9 = vcombine.high %v733_v6, %v737_v7 }
  0xf8   : > { %v530_v18 = vmax.f32 %v476_v13, 0.0  ;;  %2150 = vmatprep.mubr.msk.bf16.mxu1 %vm587_vm1, %v542_v11  ;;  %v491_v19 = vadd.f32 %v2128_v15, %v2594_v45  ;;  %1129 = vmatprep.subr.bf16.mxu0 %v2019_v1  ;;  %v2010_v11 = vcombine.low %v733_v6, %v737_v7  ;;  %v791_v15 = vld [vmem:[%s2951_s5 + $0x1d0] sm:$0xff]  ;;  %v764_v6 = vld [vmem:[%s2951_s5 + $0xf8] sm:$0xff] }
  0xf9   : > { %v485_v20 = vpop.f32.mrf.mxu0  ;;  %1233 = vmatpush1.bf16.msra.mxu1 %v2060_v10  ;;  %1130 = vmatpush1.bf16.msra.mxu0 %v2018_v3  ;;  %v738_v10 = vld [vmem:[%s2951_s5 + $0x28] sm:$0xff]  ;;  %v759_v3 = vld [vmem:[%s2951_s5 + $0xd0] sm:$0xff] }
  0xfa   : > { %v543_v22 = vpack.c.bf16 %v531_v12, %v530_v18  ;;  %v533_v23 = vmax.f32 %v491_v19, 0.0  ;;  %v486_v24 = vadd.f32 %v2594_v45, %v485_v20  ;;  %1234 = vmatprep.subr.bf16.mxu1 %v2053_v14  ;;  %v2012_v12 = vcombine.low %v734_v8, %v738_v10  ;;  %1131 = vmatprep.subr.bf16.mxu0 %v2011_v9  ;;  %v796_v20 = vld [vmem:[%s2951_s5 + $0x1f8] sm:$0xff] }
  0xfb   : > { %v2131_v26 = vpop.f32.mrf.mxu0  ;;  %v2013_v13 = vcombine.high %v734_v8, %v738_v10  ;;  %v2366_v14 = vmov 0   ;;  %v2070_v18 = vcombine.low %v791_v15, %v795_v16  ;;  %v2071_v19 = vcombine.high %v791_v15, %v795_v16  ;;  %v751_v15 = vld [vmem:[%s2951_s5 + $0x90] sm:$0xff] }
  0xfc   : > { %2151 = vmatmul.mubr.msk.bf16.gmra.mxu1 %vm587_vm1, %v543_v22  ;;  %v532_v29 = vmax.f32 %v486_v24, 0.0  ;;  %v501_v30 = vadd.f32 %v2131_v26, %v2594_v45  ;;  %1149 = vmatprep.mubr.bf16.mxu0 %v2366_v14  ;;  %v2073_v22 = vcombine.high %v792_v17, %v796_v20  ;;  %v755_v16 = vld [vmem:[%s2951_s5 + $0xb0] sm:$0xff] }
  0xfd   : > { %v495_v31 = vpop.f32.mrf.mxu0  ;;  %1235 = vmatpush1.bf16.msra.mxu1 %v2052_v21  ;;  %1132 = vmatpush1.bf16.msra.mxu0 %v2010_v11  ;;  %v2072_v21 = vcombine.low %v792_v17, %v796_v20  ;;  %v752_v17 = vld [vmem:[%s2951_s5 + $0x98] sm:$0xff] }
  0xfe   : > { %v544_v33 = vpack.c.bf16 %v533_v23, %v532_v29  ;;  %v535_v34 = vmax.f32 %v501_v30, 0.0  ;;  %v496_v35 = vadd.f32 %v2594_v45, %v495_v31  ;;  %1236 = vmatprep.subr.bf16.mxu1 %v2045_v25  ;;  %1343 = vmatprep.subr.bf16.mxu0 %v2071_v19  ;;  %v2697_v25 = vld [vmem:[%s2950_s4] ss:$0 sm:$0xff]  ;;  %v783_v31 = vld [vmem:[%s2951_s5 + $0x190] sm:$0xff] }
  0xff   : > { %v2134_v37 = vpop.f32.mrf.mxu0 }
 0x100   : > { %v534_v38 = vmax.f32 %v496_v35, 0.0  ;;  %2154 = vmatprep.mubr.msk.bf16.mxu1 %vm587_vm1, %v544_v33  ;;  %v511_v39 = vadd.f32 %v2134_v37, %v2594_v45  ;;  %v784_v35 = vld [vmem:[%s2951_s5 + $0x198] sm:$0xff] }
 0x101   : > { %v505_v40 = vpop.f32.mrf.mxu0  ;;  %1237 = vmatpush1.bf16.msra.mxu1 %v2044_v32 }
 0x102   : > { %v545_v42 = vpack.c.bf16 %v535_v34, %v534_v38  ;;  %v537_v43 = vmax.f32 %v511_v39, 0.0  ;;  %v506_v44 = vadd.f32 %v2594_v45, %v505_v40  ;;  %1238 = vmatprep.subr.bf16.mxu1 %v2037_v36  ;;  %v787_v34 = vld [vmem:[%s2951_s5 + $0x1b0] sm:$0xff]  ;;  %v788_v36 = vld [vmem:[%s2951_s5 + $0x1b8] sm:$0xff] }
 0x103   : > { %v2137_v46 = vpop.f32.mrf.mxu0  ;;  %v775_v40 = vld [vmem:[%s2951_s5 + $0x150] sm:$0xff] }
 0x104   : > { %2155 = vmatmul.mubr.msk.bf16.gmra.mxu1 %vm587_vm1, %v545_v42  ;;  %v536_v47 = vmax.f32 %v506_v44, 0.0  ;;  %v521_v48 = vadd.f32 %v2137_v46, %v2594_v45  ;;  %v2063_v42 = vcombine.high %v783_v31, %v787_v34  ;;  %v779_v44 = vld [vmem:[%s2951_s5 + $0x170] sm:$0xff]  ;;  %v776_v46 = vld [vmem:[%s2951_s5 + $0x158] sm:$0xff] }
 0x105   : > { %v515_v49 = vpop.f32.mrf.mxu0  ;;  %1239 = vmatpush1.bf16.msra.mxu1 %v2036_v41  ;;  %v2054_v59 = vcombine.low %v775_v40, %v779_v44 }
 0x106   : > { %v546_v50 = vpack.c.bf16 %v537_v43, %v536_v47  ;;  %v539_v51 = vmax.f32 %v521_v48, 0.0  ;;  %v516_v52 = vadd.f32 %v2594_v45, %v515_v49  ;;  %v754_v45 = vld [vmem:[%s2951_s5 + $0xa8] sm:$0xff]  ;;  %v2065_v43 = vcombine.high %v784_v35, %v788_v36  ;;  %v780_v47 = vld [vmem:[%s2951_s5 + $0x178] sm:$0xff] }
 0x107   : > { %v2028_v60 = vcombine.low %v750_v57, %v754_v45  ;;  %v2029_v61 = vcombine.high %v750_v57, %v754_v45  ;;  %v2062_v49 = vcombine.low %v783_v31, %v787_v34  ;;  %v771_v57 = vld [vmem:[%s2951_s5 + $0x130] sm:$0xff]  ;;  %v772_v45 = vld [vmem:[%s2951_s5 + $0x138] sm:$0xff]  ;;  %v2030_v34 = vcombine.low %v751_v15, %v755_v16 }
 0x108   : > { %v538_v53 = vmax.f32 %v516_v52, 0.0  ;;  %2158 = vmatprep.mubr.msk.bf16.mxu1 %vm587_vm1, %v546_v50  ;;  %v2064_v50 = vcombine.low %v784_v35, %v788_v36  ;;  %v2055_v52 = vcombine.high %v775_v40, %v779_v44  ;;  %v2047_v1 = vcombine.high %v767_v55, %v771_v57  ;;  %v748_v31 = vld [vmem:[%s2951_s5 + $0x78] sm:$0xff]  ;;  %v735_v40 = vld [vmem:[%s2951_s5 + $0x10] sm:$0xff] }
 0x109   : > { %1240 = vmatprep.subr.bf16.mxu1 %v2029_v61  ;;  %v2049_v2 = vcombine.high %v768_v58, %v772_v45  ;;  %v2046_v9 = vcombine.low %v767_v55, %v771_v57  ;;  %v2048_v10 = vcombine.low %v768_v58, %v772_v45 }
 0x10a   : > { %v547_v54 = vpack.c.bf16 %v539_v51, %v538_v53  ;;  %1241 = vmatpush1.bf16.msra.mxu1 %v2028_v60  ;;  %v2057_v53 = vcombine.high %v776_v46, %v780_v47  ;;  %v2056_v60 = vcombine.low %v776_v46, %v780_v47 }
 0x10b   : > { %1242 = vmatprep.subr.bf16.mxu1 %v2021_v5  ;;  %v760_v5 = vld [vmem:[%s2951_s5 + $0xd8] sm:$0xff] }
 0x10c   : > { %2159 = vmatmul.mubr.msk.bf16.gmra.mxu1 %vm587_vm1, %v547_v54  ;;  %v2040_v20 = vcombine.low %v760_v5, %v764_v6 }
 0x10d   : > { %1262 = vmatprep.mubr.bf16.mxu1 %v2366_v14 }
 0x10e   : > { %1243 = vmatpush1.bf16.msra.mxu1 %v2020_v4  ;;  %v763_v4 = vld [vmem:[%s2951_s5 + $0xf0] sm:$0xff] }
 0x10f   : > { %1244 = vmatprep.subr.bf16.mxu1 %v2013_v13  ;;  %v2041_v13 = vcombine.high %v760_v5, %v764_v6  ;;  %v2038_v19 = vcombine.low %v759_v3, %v763_v4 }
 0x112   : > { %1245 = vmatpush1.bf16.msra.mxu1 %v2012_v12  ;;  %v2039_v12 = vcombine.high %v759_v3, %v763_v4 }
 0x113   : > { %1456 = vmatprep.subr.bf16.mxu1 %v2073_v22 }
 0x1b4   : > { %v2148_v23 = vpop.f32.mrf.mxu1 }
 0x1b5   : > { %v655_v48 = vadd.f32 %v2148_v23, %v2697_v25 }
 0x1b6   : > { %v646_v24 = vpop.f32.mrf.mxu1 }
 0x1b7   : > { %v647_v27 = vadd.f32 %v2697_v25, %v646_v24  ;;  %v711_v56 = vmax.f32 %v655_v48, 0.0 }
 0x1b8   : > { %v2149_v26 = vpop.f32.mrf.mxu1 }
 0x1b9   : > { %v709_v32 = vmax.f32 %v647_v27, 0.0  ;;  %v658_v38 = vadd.f32 %v2149_v26, %v2697_v25  ;;  %v2031_v26 = vcombine.high %v751_v15, %v755_v16 }
 0x1ba   : > { %v649_v28 = vpop.f32.mrf.mxu1 }
 0x1bb   : > { %v650_v29 = vadd.f32 %v2697_v25, %v649_v28  ;;  %v712_v51 = vmax.f32 %v658_v38, 0.0  ;;  %v743_v28 = vld [vmem:[%s2951_s5 + $0x50] sm:$0xff] }
 0x1bc   : > { %v2701_v30 = vpop.f32.mrf.mxu1 }
 0x1bd   : > { %v710_v33 = vmax.f32 %v650_v29, 0.0  ;;  %v2749_v61 = vpack.c.bf16 %v712_v51, %v711_v56  ;;  %v747_v29 = vld [vmem:[%s2951_s5 + $0x70] sm:$0xff] }
 0x1be   : > { %v662_v37 = vpop.f32.mrf.mxu1  ;;  %v2022_v44 = vcombine.low %v743_v28, %v747_v29 }
 0x1bf   : > { %v2716_v39 = vpack.c.bf16 %v710_v33, %v709_v32  ;;  %v663_v62 = vadd.f32 %v2697_v25, %v662_v37  ;;  %v2023_v37 = vcombine.high %v743_v28, %v747_v29 }
 0x1c0   : > { %v2721_v41 = vpop.f32.mrf.mxu1 }
 0x1c1   : > { %1150 = vmatmul.mubr.bf16.vlgmr.msra.gmra.mxu0 %v2716_v39  ;;  %1263 = vmatmul.mubr.bf16.vlgmr.msra.gmra.mxu1 %v2716_v39  ;;  %v713_v7 = vmax.f32 %v663_v62, 0.0  ;;  %v674_v22 = vadd.f32 %v2721_v41, %v2697_v25  ;;  %v739_v41 = vld [vmem:[%s2951_s5 + $0x30] sm:$0xff] }
 0x1c2   : > { %1344 = vmatpush1.bf16.msra.mxu0 %v2070_v18  ;;  %1457 = vmatpush1.bf16.msra.mxu1 %v2072_v21  ;;  %v665_v54 = vpop.f32.mrf.mxu1  ;;  %v756_v18 = vld [vmem:[%s2951_s5 + $0xb8] sm:$0xff]  ;;  %v671_v21 = vadd.f32 %v2701_v30, %v2697_v25  ;;  %v2015_v51 = vcombine.high %v735_v40, %v739_v41  ;;  %v2014_v55 = vcombine.low %v735_v40, %v739_v41 }
 0x1c3   : > { %1159 = vmatprep.mubr.bf16.mxu0 %v2366_v14  ;;  %1272 = vmatprep.mubr.bf16.mxu1 %v2366_v14  ;;  %v666_v63 = vadd.f32 %v2697_v25, %v665_v54  ;;  %v2033_v27 = vcombine.high %v752_v17, %v756_v18  ;;  %v744_v30 = vld [vmem:[%s2951_s5 + $0x58] sm:$0xff]  ;;  %v716_v33 = vmax.f32 %v674_v22, 0.0  ;;  %v2032_v35 = vcombine.low %v752_v17, %v756_v18 }
 0x1c4   : > { %1345 = vmatprep.subr.bf16.mxu0 %v2063_v42  ;;  %1458 = vmatprep.subr.bf16.mxu1 %v2065_v43  ;;  %v2753_v0 = vpop.f32.mrf.mxu1  ;;  %v715_v32 = vmax.f32 %v671_v21, 0.0  ;;  %v2025_v38 = vcombine.high %v744_v30, %v748_v31  ;;  %v736_v42 = vld [vmem:[%s2951_s5 + $0x18] sm:$0xff]  ;;  %v2024_v46 = vcombine.low %v744_v30, %v748_v31 }
 0x1c5   : > { %v714_v8 = vmax.f32 %v666_v63, 0.0  ;;  %v740_v43 = vld [vmem:[%s2951_s5 + $0x38] sm:$0xff]  ;;  %v687_v58 = vadd.f32 %v2753_v0, %v2697_v25 }
 0x1c6   : > { %1346 = vmatpush1.bf16.msra.mxu0 %v2062_v49  ;;  %1459 = vmatpush1.bf16.msra.mxu1 %v2064_v50  ;;  %v678_v11 = vpop.f32.mrf.mxu1  ;;  %v2817_v47 = vpack.c.bf16 %v716_v33, %v715_v32  ;;  %v2016_v56 = vcombine.low %v736_v42, %v740_v43 }
 0x1c7   : > { %1347 = vmatprep.subr.bf16.mxu0 %v2055_v52  ;;  %1460 = vmatprep.subr.bf16.mxu1 %v2057_v53  ;;  %v2787_v23 = vpack.c.bf16 %v714_v8, %v713_v7  ;;  %v679_v48 = vadd.f32 %v2697_v25, %v678_v11  ;;  %v2017_v52 = vcombine.high %v736_v42, %v740_v43  ;;  %v719_v62 = vmax.f32 %v687_v58, 0.0 }
 0x1c8   : > { %v2157_v24 = vpop.f32.mrf.mxu1 }
 0x1c9   : > { %1160 = vmatmul.mubr.bf16.gmra.mxu0 %v2749_v61  ;;  %1273 = vmatmul.mubr.bf16.gmra.mxu1 %v2749_v61  ;;  %v717_v53 = vmax.f32 %v679_v48, 0.0  ;;  %v690_v45 = vadd.f32 %v2157_v24, %v2697_v25 }
 0x1ca   : > { %1169 = vmatprep.mubr.bf16.mxu0 %v2366_v14  ;;  %1282 = vmatprep.mubr.bf16.mxu1 %v2366_v14  ;;  %v681_v36 = vpop.f32.mrf.mxu1 }
 0x1cb   : > { %1348 = vmatpush1.bf16.msra.mxu0 %v2054_v59  ;;  %1461 = vmatpush1.bf16.msra.mxu1 %v2056_v60  ;;  %v682_v49 = vadd.f32 %v2697_v25, %v681_v36  ;;  %v720_v63 = vmax.f32 %v690_v45, 0.0 }
 0x1cc   : > { %1349 = vmatprep.subr.bf16.mxu0 %v2047_v1  ;;  %1462 = vmatprep.subr.bf16.mxu1 %v2049_v2  ;;  %v2160_v50 = vpop.f32.mrf.mxu1 }
 0x1cd   : > { %v718_v54 = vmax.f32 %v682_v49, 0.0  ;;  %v730_v2 = vpack.c.bf16 %v720_v63, %v719_v62  ;;  %v703_v6 = vadd.f32 %v2160_v50, %v2697_v25 }
 0x1ce   : > { %v694_v57 = vpop.f32.mrf.mxu1 }
 0x1cf   : > { %1350 = vmatpush1.bf16.msra.mxu0 %v2046_v9  ;;  %1463 = vmatpush1.bf16.msra.mxu1 %v2048_v10  ;;  %v729_v59 = vpack.c.bf16 %v718_v54, %v717_v53  ;;  %v695_v3 = vadd.f32 %v2697_v25, %v694_v57  ;;  %v723_v9 = vmax.f32 %v703_v6, 0.0 }
 0x1d0   : > { %1351 = vmatprep.subr.bf16.mxu0 %v2039_v12  ;;  %1464 = vmatprep.subr.bf16.mxu1 %v2041_v13  ;;  %v2161_v60 = vpop.f32.mrf.mxu1 }
 0x1d1   : > { %1170 = vmatmul.mubr.bf16.gmra.mxu0 %v2787_v23  ;;  %1283 = vmatmul.mubr.bf16.gmra.mxu1 %v2787_v23  ;;  %v721_v4 = vmax.f32 %v695_v3, 0.0  ;;  %v706_v7 = vadd.f32 %v2161_v60, %v2697_v25 }
 0x1d2   : > { %1179 = vmatprep.mubr.bf16.mxu0 %v2366_v14  ;;  %1292 = vmatprep.mubr.bf16.mxu1 %v2366_v14  ;;  %v697_v1 = vpop.f32.mrf.mxu1 }
 0x1d3   : > { %1352 = vmatpush1.bf16.msra.mxu0 %v2038_v19  ;;  %1465 = vmatpush1.bf16.msra.mxu1 %v2040_v20  ;;  %v698_v0 = vadd.f32 %v2697_v25, %v697_v1  ;;  %v724_v10 = vmax.f32 %v706_v7, 0.0 }
 0x1d4   : > { %1353 = vmatprep.subr.bf16.mxu0 %v2031_v26  ;;  %1466 = vmatprep.subr.bf16.mxu1 %v2033_v27 }
 0x1d5   : > { %v722_v5 = vmax.f32 %v698_v0, 0.0  ;;  %v732_v11 = vpack.c.bf16 %v724_v10, %v723_v9 }
 0x1d7   : > { %1354 = vmatpush1.bf16.msra.mxu0 %v2030_v34  ;;  %1467 = vmatpush1.bf16.msra.mxu1 %v2032_v35  ;;  %v731_v8 = vpack.c.bf16 %v722_v5, %v721_v4 }
 0x1d8   : > { %1355 = vmatprep.subr.bf16.mxu0 %v2023_v37  ;;  %1468 = vmatprep.subr.bf16.mxu1 %v2025_v38 }
 0x1d9   : > { %1180 = vmatmul.mubr.bf16.gmra.mxu0 %v2817_v47  ;;  %1293 = vmatmul.mubr.bf16.gmra.mxu1 %v2817_v47 }
 0x1da   : > { %1189 = vmatprep.mubr.bf16.mxu0 %v2366_v14  ;;  %1302 = vmatprep.mubr.bf16.mxu1 %v2366_v14 }
 0x1db   : > { %1356 = vmatpush1.bf16.msra.mxu0 %v2022_v44  ;;  %1469 = vmatpush1.bf16.msra.mxu1 %v2024_v46 }
 0x1dc   : > { %1357 = vmatprep.subr.bf16.mxu0 %v2015_v51  ;;  %1470 = vmatprep.subr.bf16.mxu1 %v2017_v52 }
 0x1df   : > { %1358 = vmatpush1.bf16.msra.mxu0 %v2014_v55  ;;  %1471 = vmatpush1.bf16.msra.mxu1 %v2016_v56 }
 0x1e1   : > { %1190 = vmatmul.mubr.bf16.gmra.mxu0 %v729_v59  ;;  %1303 = vmatmul.mubr.bf16.gmra.mxu1 %v729_v59 }
 0x1e2   : > { %1199 = vmatprep.mubr.bf16.mxu0 %v2366_v14  ;;  %1312 = vmatprep.mubr.bf16.mxu1 %v2366_v14 }
 0x1e9   : > { %1200 = vmatmul.mubr.bf16.gmra.mxu0 %v730_v2  ;;  %1313 = vmatmul.mubr.bf16.gmra.mxu1 %v730_v2 }
 0x1ea   : > { %1209 = vmatprep.mubr.bf16.mxu0 %v2366_v14  ;;  %1322 = vmatprep.mubr.bf16.mxu1 %v2366_v14 }
 0x1f1   : > { %1210 = vmatmul.mubr.bf16.gmra.mxu0 %v731_v8  ;;  %1323 = vmatmul.mubr.bf16.gmra.mxu1 %v731_v8 }
 0x1f2   : > { %1219 = vmatprep.mubr.bf16.mxu0 %v2366_v14  ;;  %1332 = vmatprep.mubr.bf16.mxu1 %v2366_v14 }
 0x1f9   : > { %1220 = vmatmul.mubr.bf16.gmra.mxu0 %v732_v11  ;;  %1333 = vmatmul.mubr.bf16.gmra.mxu1 %v732_v11 }
 0x1fa   : > { %1375 = vmatprep.mubr.bf16.mxu0 %v2366_v14  ;;  %1488 = vmatprep.mubr.bf16.mxu1 %v2366_v14 }
 0x201   : > { %1376 = vmatmul.mubr.bf16.vlgmr.msra.gmra.mxu0 %v2716_v39  ;;  %1489 = vmatmul.mubr.bf16.vlgmr.msra.gmra.mxu1 %v2716_v39 }
 0x202   : > { %1385 = vmatprep.mubr.bf16.mxu0 %v2366_v14  ;;  %1498 = vmatprep.mubr.bf16.mxu1 %v2366_v14 }
 0x209   : > { %1386 = vmatmul.mubr.bf16.gmra.mxu0 %v2749_v61  ;;  %1499 = vmatmul.mubr.bf16.gmra.mxu1 %v2749_v61 }
 0x20a   : > { %1395 = vmatprep.mubr.bf16.mxu0 %v2366_v14  ;;  %1508 = vmatprep.mubr.bf16.mxu1 %v2366_v14 }
 0x211   : > { %1396 = vmatmul.mubr.bf16.gmra.mxu0 %v2787_v23  ;;  %1509 = vmatmul.mubr.bf16.gmra.mxu1 %v2787_v23 }
 0x212   : > { %1405 = vmatprep.mubr.bf16.mxu0 %v2366_v14  ;;  %1518 = vmatprep.mubr.bf16.mxu1 %v2366_v14 }
 0x219   : > { %1406 = vmatmul.mubr.bf16.gmra.mxu0 %v2817_v47  ;;  %1519 = vmatmul.mubr.bf16.gmra.mxu1 %v2817_v47 }
 0x21a   : > { %1415 = vmatprep.mubr.bf16.mxu0 %v2366_v14  ;;  %1528 = vmatprep.mubr.bf16.mxu1 %v2366_v14 }
 0x221   : > { %1416 = vmatmul.mubr.bf16.gmra.mxu0 %v729_v59  ;;  %1529 = vmatmul.mubr.bf16.gmra.mxu1 %v729_v59 }
 0x222   : > { %1425 = vmatprep.mubr.bf16.mxu0 %v2366_v14  ;;  %1538 = vmatprep.mubr.bf16.mxu1 %v2366_v14 }
 0x229   : > { %1426 = vmatmul.mubr.bf16.gmra.mxu0 %v730_v2  ;;  %1539 = vmatmul.mubr.bf16.gmra.mxu1 %v730_v2 }
 0x22a   : > { %1435 = vmatprep.mubr.bf16.mxu0 %v2366_v14  ;;  %1548 = vmatprep.mubr.bf16.mxu1 %v2366_v14 }
 0x231   : > { %1436 = vmatmul.mubr.bf16.gmra.mxu0 %v731_v8  ;;  %1549 = vmatmul.mubr.bf16.gmra.mxu1 %v731_v8 }
 0x232   : > { %1445 = vmatprep.mubr.bf16.mxu0 %v2366_v14  ;;  %1558 = vmatprep.mubr.bf16.mxu1 %v2366_v14 }
 0x239   : > { %1446 = vmatmul.mubr.bf16.gmra.mxu0 %v732_v11  ;;  %1559 = vmatmul.mubr.bf16.gmra.mxu1 %v732_v11 }
 0x281   : > { %v1151_v25 = vpop.f32.mrf.mxu0  ;;  %v1264_v39 = vpop.f32.mrf.mxu1 }
 0x283   : > { %v1153_v61 = vpop.f32.mrf.mxu0  ;;  %v1266_v12 = vpop.f32.mrf.mxu1 }
 0x285   : > { %v1155_v13 = vpop.f32.mrf.mxu0  ;;  %v1268_v15 = vpop.f32.mrf.mxu1 }
 0x286   : > { %v1569_v16 = vmax.f32 %v1151_v25, %v1155_v13  ;;  %v1611_v17 = vmax.f32 %v1264_v39, %v1268_v15 }
 0x287   : > { %v1157_v18 = vpop.f32.mrf.mxu0  ;;  %v1270_v19 = vpop.f32.mrf.mxu1 }
 0x288   : > { %v1590_v20 = vmax.f32 %v1153_v61, %v1157_v18  ;;  %v1632_v21 = vmax.f32 %v1266_v12, %v1270_v19 }
 0x289   : > { %v1161_v22 = vpop.f32.mrf.mxu0  ;;  %v1274_v23 = vpop.f32.mrf.mxu1 }
 0x28a   : > { %v1570_v24 = vmax.f32 %v1569_v16, %v1161_v22  ;;  %v1612_v26 = vmax.f32 %v1611_v17, %v1274_v23 }
 0x28b   : > { %v1163_v27 = vpop.f32.mrf.mxu0  ;;  %v1276_v14 = vpop.f32.mrf.mxu1 }
 0x28c   : > { %v1591_v28 = vmax.f32 %v1590_v20, %v1163_v27  ;;  %v1633_v29 = vmax.f32 %v1632_v21, %v1276_v14 }
 0x28d   : > { %v1165_v30 = vpop.f32.mrf.mxu0  ;;  %v1278_v31 = vpop.f32.mrf.mxu1 }
 0x28e   : > { %v1571_v32 = vmax.f32 %v1570_v24, %v1165_v30  ;;  %v1613_v33 = vmax.f32 %v1612_v26, %v1278_v31 }
 0x28f   : > { %v1167_v34 = vpop.f32.mrf.mxu0  ;;  %v1280_v35 = vpop.f32.mrf.mxu1 }
 0x290   : > { %v1592_v36 = vmax.f32 %v1591_v28, %v1167_v34  ;;  %v1634_v37 = vmax.f32 %v1633_v29, %v1280_v35 }
 0x291   : > { %v1171_v38 = vpop.f32.mrf.mxu0  ;;  %v1284_v40 = vpop.f32.mrf.mxu1 }
 0x292   : > { %v1572_v41 = vmax.f32 %v1571_v32, %v1171_v38  ;;  %v1614_v42 = vmax.f32 %v1613_v33, %v1284_v40 }
 0x293   : > { %v1173_v43 = vpop.f32.mrf.mxu0  ;;  %v1286_v44 = vpop.f32.mrf.mxu1 }
 0x294   : > { %v1593_v46 = vmax.f32 %v1592_v36, %v1173_v43  ;;  %v1635_v47 = vmax.f32 %v1634_v37, %v1286_v44 }
 0x295   : > { %v1175_v48 = vpop.f32.mrf.mxu0  ;;  %v1288_v49 = vpop.f32.mrf.mxu1 }
 0x296   : > { %v1573_v50 = vmax.f32 %v1572_v41, %v1175_v48  ;;  %v1615_v51 = vmax.f32 %v1614_v42, %v1288_v49 }
 0x297   : > { %v1177_v52 = vpop.f32.mrf.mxu0  ;;  %v1290_v53 = vpop.f32.mrf.mxu1 }
 0x298   : > { %v1594_v54 = vmax.f32 %v1593_v46, %v1177_v52  ;;  %v1636_v55 = vmax.f32 %v1635_v47, %v1290_v53 }
 0x299   : > { %v1181_v56 = vpop.f32.mrf.mxu0  ;;  %v1294_v57 = vpop.f32.mrf.mxu1 }
 0x29a   : > { %v1574_v58 = vmax.f32 %v1573_v50, %v1181_v56  ;;  %v1616_v45 = vmax.f32 %v1615_v51, %v1294_v57 }
 0x29b   : > { %v1183_v59 = vpop.f32.mrf.mxu0  ;;  %v1296_v60 = vpop.f32.mrf.mxu1 }
 0x29c   : > { %v1595_v62 = vmax.f32 %v1594_v54, %v1183_v59  ;;  %v1637_v63 = vmax.f32 %v1636_v55, %v1296_v60 }
 0x29d   : > { %v1185_v1 = vpop.f32.mrf.mxu0  ;;  %v1298_v2 = vpop.f32.mrf.mxu1 }
 0x29e   : > { %v1575_v3 = vmax.f32 %v1574_v58, %v1185_v1  ;;  %v1617_v0 = vmax.f32 %v1616_v45, %v1298_v2 }
 0x29f   : > { %v1187_v4 = vpop.f32.mrf.mxu0  ;;  %v1300_v5 = vpop.f32.mrf.mxu1 }
 0x2a0   : > { %v1596_v6 = vmax.f32 %v1595_v62, %v1187_v4  ;;  %v1638_v7 = vmax.f32 %v1637_v63, %v1300_v5 }
 0x2a1   : > { %v1191_v8 = vpop.f32.mrf.mxu0  ;;  %v1304_v9 = vpop.f32.mrf.mxu1 }
 0x2a2   : > { %v1576_v10 = vmax.f32 %v1575_v3, %v1191_v8  ;;  %v1618_v11 = vmax.f32 %v1617_v0, %v1304_v9 }
 0x2a3   : > { %v1193_v25 = vpop.f32.mrf.mxu0  ;;  %v1306_v39 = vpop.f32.mrf.mxu1 }
 0x2a4   : > { %v1597_v61 = vmax.f32 %v1596_v6, %v1193_v25  ;;  %v1639_v12 = vmax.f32 %v1638_v7, %v1306_v39 }
 0x2a5   : > { %v1195_v13 = vpop.f32.mrf.mxu0  ;;  %v1308_v15 = vpop.f32.mrf.mxu1 }
 0x2a6   : > { %v1577_v16 = vmax.f32 %v1576_v10, %v1195_v13  ;;  %v1619_v17 = vmax.f32 %v1618_v11, %v1308_v15 }
 0x2a7   : > { %v1197_v18 = vpop.f32.mrf.mxu0  ;;  %v1310_v19 = vpop.f32.mrf.mxu1 }
 0x2a8   : > { %v1598_v20 = vmax.f32 %v1597_v61, %v1197_v18  ;;  %v1640_v21 = vmax.f32 %v1639_v12, %v1310_v19 }
 0x2a9   : > { %v1201_v22 = vpop.f32.mrf.mxu0  ;;  %v1314_v23 = vpop.f32.mrf.mxu1 }
 0x2aa   : > { %v1578_v24 = vmax.f32 %v1577_v16, %v1201_v22  ;;  %v1620_v26 = vmax.f32 %v1619_v17, %v1314_v23 }
 0x2ab   : > { %v1203_v27 = vpop.f32.mrf.mxu0  ;;  %v1316_v14 = vpop.f32.mrf.mxu1 }
 0x2ac   : > { %v1599_v28 = vmax.f32 %v1598_v20, %v1203_v27  ;;  %v1641_v29 = vmax.f32 %v1640_v21, %v1316_v14 }
 0x2ad   : > { %v1205_v30 = vpop.f32.mrf.mxu0  ;;  %v1318_v31 = vpop.f32.mrf.mxu1 }
 0x2ae   : > { %v1579_v32 = vmax.f32 %v1578_v24, %v1205_v30  ;;  %v1621_v33 = vmax.f32 %v1620_v26, %v1318_v31 }
 0x2af   : > { %v1207_v34 = vpop.f32.mrf.mxu0  ;;  %v1320_v35 = vpop.f32.mrf.mxu1 }
 0x2b0   : > { %v1600_v36 = vmax.f32 %v1599_v28, %v1207_v34  ;;  %v1642_v37 = vmax.f32 %v1641_v29, %v1320_v35 }
 0x2b1   : > { %v1211_v38 = vpop.f32.mrf.mxu0  ;;  %v1324_v40 = vpop.f32.mrf.mxu1 }
 0x2b2   : > { %v1580_v41 = vmax.f32 %v1579_v32, %v1211_v38  ;;  %v1622_v42 = vmax.f32 %v1621_v33, %v1324_v40 }
 0x2b3   : > { %v1213_v43 = vpop.f32.mrf.mxu0  ;;  %v1326_v44 = vpop.f32.mrf.mxu1 }
 0x2b4   : > { %v1601_v46 = vmax.f32 %v1600_v36, %v1213_v43  ;;  %v1643_v47 = vmax.f32 %v1642_v37, %v1326_v44 }
 0x2b5   : > { %v1215_v48 = vpop.f32.mrf.mxu0  ;;  %v1328_v49 = vpop.f32.mrf.mxu1 }
 0x2b6   : > { %v1581_v50 = vmax.f32 %v1580_v41, %v1215_v48  ;;  %v1623_v51 = vmax.f32 %v1622_v42, %v1328_v49 }
 0x2b7   : > { %v1217_v52 = vpop.f32.mrf.mxu0  ;;  %v1330_v53 = vpop.f32.mrf.mxu1 }
 0x2b8   : > { %v1602_v54 = vmax.f32 %v1601_v46, %v1217_v52  ;;  %v1644_v55 = vmax.f32 %v1643_v47, %v1330_v53 }
 0x2b9   : > { %v1221_v56 = vpop.f32.mrf.mxu0  ;;  %v1334_v57 = vpop.f32.mrf.mxu1 }
 0x2ba   : > { %v1582_v58 = vmax.f32 %v1581_v50, %v1221_v56  ;;  %v1624_v45 = vmax.f32 %v1623_v51, %v1334_v57 }
 0x2bb   : > { %v1223_v59 = vpop.f32.mrf.mxu0  ;;  %v1336_v60 = vpop.f32.mrf.mxu1 }
 0x2bc   : > { %v1603_v62 = vmax.f32 %v1602_v54, %v1223_v59  ;;  %v1645_v63 = vmax.f32 %v1644_v55, %v1336_v60 }
 0x2bd   : > { %v1225_v1 = vpop.f32.mrf.mxu0  ;;  %v1338_v2 = vpop.f32.mrf.mxu1 }
 0x2be   : > { %v1583_v3 = vmax.f32 %v1582_v58, %v1225_v1  ;;  %v1625_v0 = vmax.f32 %v1624_v45, %v1338_v2 }
 0x2bf   : > { %v1227_v4 = vpop.f32.mrf.mxu0  ;;  %v1340_v5 = vpop.f32.mrf.mxu1 }
 0x2c0   : > { %v1584_v6 = vrot.slane %v1583_v3, 4  ;;  %v1626_v7 = vrot.slane %v1625_v0, 4  ;;  %v1604_v8 = vmax.f32 %v1603_v62, %v1227_v4  ;;  %v1646_v9 = vmax.f32 %v1645_v63, %v1340_v5 }
 0x2c1   : > { %v2862_v10 = vpop.f32.mrf.mxu0  ;;  %v2864_v11 = vpop.f32.mrf.mxu1 }
 0x2c2   : > { %v1585_v25 = vmax.f32 %v1583_v3, %v1584_v6  ;;  %v1627_v39 = vmax.f32 %v1625_v0, %v1626_v7  ;;  %v1605_v61 = vrot.slane %v1604_v8, 4  ;;  %v1647_v12 = vrot.slane %v1646_v9, 4 }
 0x2c3   : > { %v1379_v13 = vpop.f32.mrf.mxu0  ;;  %v1492_v15 = vpop.f32.mrf.mxu1 }
 0x2c4   : > { %v1586_v16 = vrot.slane %v1585_v25, 2  ;;  %v1628_v17 = vrot.slane %v1627_v39, 2  ;;  %v1606_v18 = vmax.f32 %v1604_v8, %v1605_v61  ;;  %v1648_v19 = vmax.f32 %v1646_v9, %v1647_v12 }
 0x2c5   : > { %v1381_v20 = vpop.f32.mrf.mxu0  ;;  %v1494_v21 = vpop.f32.mrf.mxu1 }
 0x2c6   : > { %v1587_v22 = vmax.f32 %v1585_v25, %v1586_v16  ;;  %v1629_v23 = vmax.f32 %v1627_v39, %v1628_v17  ;;  %v1607_v24 = vrot.slane %v1606_v18, 2  ;;  %v1649_v26 = vrot.slane %v1648_v19, 2 }
 0x2c7   : > { %v1383_v27 = vpop.f32.mrf.mxu0  ;;  %v1496_v14 = vpop.f32.mrf.mxu1  ;;  %v1653_v3 = vmax.f32 %v2862_v10, %v1381_v20  ;;  %v1695_v0 = vmax.f32 %v2864_v11, %v1494_v21 }
 0x2c8   : > { %v1588_v28 = vrot.slane %v1587_v22, 1  ;;  %v1630_v29 = vrot.slane %v1629_v23, 1  ;;  %v1608_v30 = vmax.f32 %v1606_v18, %v1607_v24  ;;  %v1650_v31 = vmax.f32 %v1648_v19, %v1649_v26 }
 0x2c9   : > { %v1387_v32 = vpop.f32.mrf.mxu0  ;;  %v1500_v33 = vpop.f32.mrf.mxu1  ;;  %v1674_v6 = vmax.f32 %v1379_v13, %v1383_v27  ;;  %v1716_v7 = vmax.f32 %v1492_v15, %v1496_v14 }
 0x2ca   : > { %v2866_v34 = vmax.f32 %v1587_v22, %v1588_v28  ;;  %v2868_v35 = vmax.f32 %v1629_v23, %v1630_v29  ;;  %v1609_v36 = vrot.slane %v1608_v30, 1  ;;  %v1651_v37 = vrot.slane %v1650_v31, 1 }
 0x2cb   : > { %v1389_v38 = vpop.f32.mrf.mxu0  ;;  %v1502_v40 = vpop.f32.mrf.mxu1  ;;  %v1654_v8 = vmax.f32 %v1653_v3, %v1387_v32  ;;  %v1696_v9 = vmax.f32 %v1695_v0, %v1500_v33 }
 0x2cc   : > { %v2870_v41 = vmax.f32 %v1608_v30, %v1609_v36  ;;  %v2872_v42 = vmax.f32 %v1650_v31, %v1651_v37  ;;  %v1675_v61 = vmax.f32 %v1674_v6, %v1389_v38  ;;  %v1717_v12 = vmax.f32 %v1716_v7, %v1502_v40 }
 0x2cd   : > { %v1391_v43 = vpop.f32.mrf.mxu0  ;;  %v1504_v44 = vpop.f32.mrf.mxu1 }
 0x2ce   : > { %v1655_v16 = vmax.f32 %v1654_v8, %v1391_v43  ;;  %v1697_v17 = vmax.f32 %v1696_v9, %v1504_v44 }
 0x2cf   : > { %v1393_v46 = vpop.f32.mrf.mxu0  ;;  %v1506_v47 = vpop.f32.mrf.mxu1 }
 0x2d0   : > { %v1676_v22 = vmax.f32 %v1675_v61, %v1393_v46  ;;  %v1718_v23 = vmax.f32 %v1717_v12, %v1506_v47 }
 0x2d1   : > { %v1397_v48 = vpop.f32.mrf.mxu0  ;;  %v1510_v49 = vpop.f32.mrf.mxu1 }
 0x2d2   : > { %v1656_v24 = vmax.f32 %v1655_v16, %v1397_v48  ;;  %v1698_v10 = vmax.f32 %v1697_v17, %v1510_v49 }
 0x2d3   : > { %v1399_v50 = vpop.f32.mrf.mxu0  ;;  %v1512_v51 = vpop.f32.mrf.mxu1 }
 0x2d4   : > { %v1677_v21 = vmax.f32 %v1676_v22, %v1399_v50  ;;  %v1719_v26 = vmax.f32 %v1718_v23, %v1512_v51 }
 0x2d5   : > { %v1401_v52 = vpop.f32.mrf.mxu0  ;;  %v1514_v53 = vpop.f32.mrf.mxu1 }
 0x2d6   : > { %v1657_v13 = vmax.f32 %v1656_v24, %v1401_v52  ;;  %v1699_v15 = vmax.f32 %v1698_v10, %v1514_v53 }
 0x2d7   : > { %v1403_v54 = vpop.f32.mrf.mxu0  ;;  %v1516_v55 = vpop.f32.mrf.mxu1 }
 0x2d8   : > { %v1678_v28 = vmax.f32 %v1677_v21, %v1403_v54  ;;  %v1720_v29 = vmax.f32 %v1719_v26, %v1516_v55 }
 0x2d9   : > { %v1407_v56 = vpop.f32.mrf.mxu0  ;;  %v1520_v57 = vpop.f32.mrf.mxu1 }
 0x2da   : > { %v1658_v30 = vmax.f32 %v1657_v13, %v1407_v56  ;;  %v1700_v31 = vmax.f32 %v1699_v15, %v1520_v57 }
 0x2db   : > { %v1409_v58 = vpop.f32.mrf.mxu0  ;;  %v1522_v45 = vpop.f32.mrf.mxu1 }
 0x2dc   : > { %v1679_v36 = vmax.f32 %v1678_v28, %v1409_v58  ;;  %v1721_v37 = vmax.f32 %v1720_v29, %v1522_v45 }
 0x2dd   : > { %v1411_v59 = vpop.f32.mrf.mxu0  ;;  %v1524_v60 = vpop.f32.mrf.mxu1 }
 0x2de   : > { %v1659_v38 = vmax.f32 %v1658_v30, %v1411_v59  ;;  %v1701_v40 = vmax.f32 %v1700_v31, %v1524_v60 }
 0x2df   : > { %v1413_v62 = vpop.f32.mrf.mxu0  ;;  %v1526_v63 = vpop.f32.mrf.mxu1 }
 0x2e0   : > { %v1680_v46 = vmax.f32 %v1679_v36, %v1413_v62  ;;  %v1722_v47 = vmax.f32 %v1721_v37, %v1526_v63 }
 0x2e1   : > { %v1417_v1 = vpop.f32.mrf.mxu0  ;;  %v1530_v2 = vpop.f32.mrf.mxu1 }
 0x2e2   : > { %v1660_v48 = vmax.f32 %v1659_v38, %v1417_v1  ;;  %v1702_v49 = vmax.f32 %v1701_v40, %v1530_v2 }
 0x2e3   : > { %v1419_v4 = vpop.f32.mrf.mxu0  ;;  %v1532_v5 = vpop.f32.mrf.mxu1 }
 0x2e4   : > { %v1681_v52 = vmax.f32 %v1680_v46, %v1419_v4  ;;  %v1723_v53 = vmax.f32 %v1722_v47, %v1532_v5 }
 0x2e5   : > { %v1421_v25 = vpop.f32.mrf.mxu0  ;;  %v1534_v39 = vpop.f32.mrf.mxu1 }
 0x2e6   : > { %v1661_v54 = vmax.f32 %v1660_v48, %v1421_v25  ;;  %v1703_v55 = vmax.f32 %v1702_v49, %v1534_v39 }
 0x2e7   : > { %v1423_v18 = vpop.f32.mrf.mxu0  ;;  %v1536_v19 = vpop.f32.mrf.mxu1 }
 0x2e8   : > { %v1682_v3 = vmax.f32 %v1681_v52, %v1423_v18  ;;  %v1724_v0 = vmax.f32 %v1723_v53, %v1536_v19 }
 0x2e9   : > { %v1427_v20 = vpop.f32.mrf.mxu0  ;;  %v1540_v11 = vpop.f32.mrf.mxu1 }
 0x2ea   : > { %v1662_v58 = vmax.f32 %v1661_v54, %v1427_v20  ;;  %v1704_v45 = vmax.f32 %v1703_v55, %v1540_v11 }
 0x2eb   : > { %v1429_v27 = vpop.f32.mrf.mxu0  ;;  %v1542_v14 = vpop.f32.mrf.mxu1 }
 0x2ec   : > { %v1683_v6 = vmax.f32 %v1682_v3, %v1429_v27  ;;  %v1725_v7 = vmax.f32 %v1724_v0, %v1542_v14 }
 0x2ed   : > { %v1431_v32 = vpop.f32.mrf.mxu0  ;;  %v1544_v33 = vpop.f32.mrf.mxu1 }
 0x2ee   : > { %v1663_v62 = vmax.f32 %v1662_v58, %v1431_v32  ;;  %v1705_v63 = vmax.f32 %v1704_v45, %v1544_v33 }
 0x2ef   : > { %v1433_v43 = vpop.f32.mrf.mxu0  ;;  %v1546_v44 = vpop.f32.mrf.mxu1 }
 0x2f0   : > { %v1684_v8 = vmax.f32 %v1683_v6, %v1433_v43  ;;  %v1726_v9 = vmax.f32 %v1725_v7, %v1546_v44 }
 0x2f1   : > { %v1437_v50 = vpop.f32.mrf.mxu0  ;;  %v1550_v51 = vpop.f32.mrf.mxu1 }
 0x2f2   : > { %v1664_v4 = vmax.f32 %v1663_v62, %v1437_v50  ;;  %v1706_v5 = vmax.f32 %v1705_v63, %v1550_v51 }
 0x2f3   : > { %v1439_v56 = vpop.f32.mrf.mxu0  ;;  %v1552_v57 = vpop.f32.mrf.mxu1 }
 0x2f4   : > { %v1685_v61 = vmax.f32 %v1684_v8, %v1439_v56  ;;  %v1727_v12 = vmax.f32 %v1726_v9, %v1552_v57 }
 0x2f5   : > { %v1441_v59 = vpop.f32.mrf.mxu0  ;;  %v1554_v60 = vpop.f32.mrf.mxu1 }
 0x2f6   : > { %v1665_v16 = vmax.f32 %v1664_v4, %v1441_v59  ;;  %v1707_v17 = vmax.f32 %v1706_v5, %v1554_v60 }
 0x2f7   : > { %v1443_v1 = vpop.f32.mrf.mxu0  ;;  %v1556_v2 = vpop.f32.mrf.mxu1 }
 0x2f8   : > { %v1686_v22 = vmax.f32 %v1685_v61, %v1443_v1  ;;  %v1728_v23 = vmax.f32 %v1727_v12, %v1556_v2 }
 0x2f9   : > { %v1447_v25 = vpop.f32.mrf.mxu0  ;;  %v1560_v39 = vpop.f32.mrf.mxu1 }
 0x2fa   : > { %v1666_v24 = vmax.f32 %v1665_v16, %v1447_v25  ;;  %v1708_v10 = vmax.f32 %v1707_v17, %v1560_v39 }
 0x2fb   : > { %v1449_v18 = vpop.f32.mrf.mxu0  ;;  %v1562_v19 = vpop.f32.mrf.mxu1 }
 0x2fc   : > { %v1687_v21 = vmax.f32 %v1686_v22, %v1449_v18  ;;  %v1729_v26 = vmax.f32 %v1728_v23, %v1562_v19 }
 0x2fd   : > { %v1451_v20 = vpop.f32.mrf.mxu0  ;;  %v1564_v11 = vpop.f32.mrf.mxu1 }
 0x2fe   : > { %v1667_v13 = vmax.f32 %v1666_v24, %v1451_v20  ;;  %v1709_v15 = vmax.f32 %v1708_v10, %v1564_v11 }
 0x2ff   : > { %v1453_v27 = vpop.f32.mrf.mxu0  ;;  %v1566_v14 = vpop.f32.mrf.mxu1 }
 0x300   : > { %v1668_v28 = vrot.slane %v1667_v13, 4  ;;  %v1710_v29 = vrot.slane %v1709_v15, 4  ;;  %v1688_v30 = vmax.f32 %v1687_v21, %v1453_v27  ;;  %v1730_v31 = vmax.f32 %v1729_v26, %v1566_v14 }
 0x302   : > { %v1669_v32 = vmax.f32 %v1667_v13, %v1668_v28  ;;  %v1711_v33 = vmax.f32 %v1709_v15, %v1710_v29  ;;  %v1689_v36 = vrot.slane %v1688_v30, 4  ;;  %v1731_v37 = vrot.slane %v1730_v31, 4 }
 0x304   : > { %v1670_v38 = vrot.slane %v1669_v32, 2  ;;  %v1712_v40 = vrot.slane %v1711_v33, 2  ;;  %v1690_v43 = vmax.f32 %v1688_v30, %v1689_v36  ;;  %v1732_v44 = vmax.f32 %v1730_v31, %v1731_v37 }
 0x306   : > { %v1671_v46 = vmax.f32 %v1669_v32, %v1670_v38  ;;  %v1713_v47 = vmax.f32 %v1711_v33, %v1712_v40  ;;  %v1691_v48 = vrot.slane %v1690_v43, 2  ;;  %v1733_v49 = vrot.slane %v1732_v44, 2 }
 0x308   : > { %v1672_v50 = vrot.slane %v1671_v46, 1  ;;  %v1714_v51 = vrot.slane %v1713_v47, 1  ;;  %v1692_v52 = vmax.f32 %v1690_v43, %v1691_v48  ;;  %v1734_v53 = vmax.f32 %v1732_v44, %v1733_v49  ;;  %1740 = sbr.rel (%p2074_p1) target bundleno = 797 (0x31d), region = 48 }
 0x30a   : > { %v1673_v54 = vmax.f32 %v1671_v46, %v1672_v50  ;;  %v1715_v55 = vmax.f32 %v1713_v47, %v1714_v51  ;;  %v1693_v56 = vrot.slane %v1692_v52, 1  ;;  %v1735_v57 = vrot.slane %v1734_v53, 1 }
 0x30c   : > { %v1694_v3 = vmax.f32 %v1692_v52, %v1693_v56  ;;  %v1736_v0 = vmax.f32 %v1734_v53, %v1735_v57 }
 0x30d   : > { %v1756_v58 = vlaneseq  ;;  %v2367_v45 = vmov 1966171168   ;;  %v1749_v60 = vcombine.low %v2866_v34, %v2870_v41  ;;  %v1750_v7 = vcombine.low %v2868_v35, %v2872_v42 }
 0x30e   : > { %v1754_v59 = vunpack.c.l.s4 %v2367_v45  ;;  %v1751_v62 = vcombine.low %v1673_v54, %v1694_v3  ;;  %v1752_v63 = vcombine.low %v1715_v55, %v1736_v0 }
 0x30f   : > { %v1757_v6 = vshrl.u32 %v1756_v58, 7 }
 0x310   : > { %v1755_v1 = vunpack.c.0.s8 %v1754_v59 }
 0x312   : > { %v1758_v2 = vsub.s32 %v1755_v1, %v1757_v6 }
 0x314   : > { %v1759_v8 = vrot.slane %v1749_v60, %v1758_v2  ;;  %v1766_v9 = vrot.slane %v1750_v7, %v1758_v2  ;;  %v1773_v4 = vrot.slane %v1751_v62, %v1758_v2  ;;  %v1780_v5 = vrot.slane %v1752_v63, %v1758_v2 }
 0x316   : > { %v1781_v25 = vcombine.low %v1759_v8, %v1766_v9  ;;  %v1782_v39 = vcombine.low %v1773_v4, %v1780_v5 }
 0x318   : > { %v1789_v61 = vrot.slane %v1781_v25, %v1758_v2  ;;  %v1796_v12 = vrot.slane %v1782_v39, %v1758_v2 }
 0x31a   : > { %v1797_v16 = vcombine.low %v1789_v61, %v1796_v12 }
 0x31c   : > { %1799 = vst [vmem:[%s2877_s18] sm:$0xff] %v1797_v16 }
 0x31d PF: > { %p2075_p2 = scmp.le.s32.totalorder %s2340_s24, 0 }
 0x31f   : > { %1803 = sbr.rel (%p2075_p2) target bundleno = 822 (0x336), region = 52 }
 0x324   : > { %v1820_v17 = vlaneseq  ;;  %v2368_v18 = vmov 1966171168   ;;  %v1813_v22 = vcombine.low %v2866_v34, %v2870_v41  ;;  %v1814_v24 = vcombine.low %v2868_v35, %v2872_v42  ;;  %v1804_v31 = vld [vmem:[%s2877_s18] sm:$0xff] }
 0x325   : > { %v1818_v19 = vunpack.c.l.s4 %v2368_v18  ;;  %v1815_v10 = vcombine.low %v1673_v54, %v1694_v3  ;;  %v1816_v20 = vcombine.low %v1715_v55, %v1736_v0 }
 0x326   : > { %v1821_v23 = vshrl.u32 %v1820_v17, 7 }
 0x327   : > { %v1819_v11 = vunpack.c.0.s8 %v1818_v19 }
 0x329   : > { %v1822_v21 = vsub.s32 %v1819_v11, %v1821_v23 }
 0x32b   : > { %v1823_v26 = vrot.slane %v1813_v22, %v1822_v21  ;;  %v1830_v13 = vrot.slane %v1814_v24, %v1822_v21  ;;  %v1837_v15 = vrot.slane %v1815_v10, %v1822_v21  ;;  %v1844_v27 = vrot.slane %v1816_v20, %v1822_v21 }
 0x32d   : > { %v1845_v14 = vcombine.low %v1823_v26, %v1830_v13  ;;  %v1846_v28 = vcombine.low %v1837_v15, %v1844_v27 }
 0x32f   : > { %v1853_v29 = vrot.slane %v1845_v14, %v1822_v21  ;;  %v1860_v30 = vrot.slane %v1846_v28, %v1822_v21 }
 0x331   : > { %v1861_v32 = vcombine.low %v1853_v29, %v1860_v30 }
 0x333   : > { %v1863_v34 = vmax.f32 %v1804_v31, %v1861_v32 }
 0x335   : > { %1864 = vst [vmem:[%s2877_s18] sm:$0xff] %v1863_v34 }
 0x336 PF: > { %s2077_s24 = sshll.u32 %s2348_s26, 1  ;;  %s1882_s19 = sshll.u32 %s2877_s18, 4  ;;  %s1883_s19 = int_to_ptr.vmem [resolvable:$true] %s1882_s19 }
 0x337   : > { %s1874_s16 = sadd.s32 %s2344_s25, %s2077_s24  ;;  %s2965_s9 = sand.u32 1, %s2332_s22  }
 0x338   : > { %s2082_s8 = sshll.u32 %s1874_s16, 7  ;;  %s1866_s11 = scalar_lea.sflag [#allocation3], %s2965_s9 }
 0x339   : > { %s1880_s1 = scalar_lea.hbm %s2952_s6, %s2082_s8  ;;  %s2256_s7 = scalar_lea.vmem %s1883_s19, 128 }
 0x33a   : > { %p2257_p3 = scmp.ne.s32.totalorder %s1883_s19, %s2256_s7  ;;  %s2369_s15 = smov [#allocation2]  }
 0x33b   : > { %s2260_s17 = sshll.u32 %s2369_s15, 4  ;;  %s2261_s17 = int_to_ptr.vmem [resolvable:$false] %s2260_s17 }
 0x33c   : > { %p2258_p4 = pnand %p2257_p3, %p2471_p6  ;;  %s2262_s0 = scalar_lea.vmem %s2261_s17, 256 }
 0x33d   : > { %p2263_p8 = scmp.lt.s32.totalorder %s1883_s19, %s2261_s17  ;;  %p2264_p9 = scmp.lt.s32.totalorder %s2262_s0, %s2256_s7 }
 0x33e   : > { %p2259_p5 = pneg %p2258_p4 }
 0x33f   : > { %p2265_p10 = por %p2264_p9, %p2263_p8 }
 0x341   : > { %p2266_p11 = pnand %p2265_p10, %p2259_p5 }
 0x343   : > { %2269 = shalt.err (!%p2266_p11)
}
 0x344   : > { %s2270_s25 = scalar_lea.hbm %s1880_s1, 128  ;;  %s2274_s24 = scalar_lea.hbm %s2952_s6, 512 }
 0x345   : > { %p2271_p12 = scmp.ne.s32.totalorder %s1880_s1, %s2270_s25  ;;  %p2275_p1 = scmp.lt.s32.totalorder %s1880_s1, %s2952_s6 }
 0x346   : > { %p2276_p2 = scmp.lt.s32.totalorder %s2274_s24, %s2270_s25 }
 0x347   : > { %p2272_p13 = pnand %p2271_p12, %p2471_p6 }
 0x348   : > { %p2277_p3 = por %p2276_p2, %p2275_p1 }
 0x349   : > { %p2273_p0 = pneg %p2272_p13 }
 0x34b   : > { %p2278_p4 = pnand %p2277_p3, %p2273_p0 }
 0x34d   : > { %2281 = shalt.err (!%p2278_p4)
}
 0x34e   : > { %2162 = dma.vmem_to_hbm [thread:$0]  (%p2471_p6), %s1883_s19, 128, %s1880_s1, %s1866_s11  }
 0x34f PF: > { %p2168_p5 = scmp.ge.s32.totalorder %s2364_s30, 2  ;;  %s1894_s0 = sand.u32 1, %s2328_s21  }
 0x350   : > { %s1895_s10 = scalar_lea.sflag [#allocation3], %s1894_s0 }
 0x351   : > { %p2165_p8 = pnand %p2168_p5, %p2475_p7 }
 0x353   : > { %p2166_p9 = pneg %p2165_p8 }
 0x355   : > { %2323 = dma.done.wait (%p2166_p9), %s1895_s10, 128  }
 0x356   : > { %2325 = vsyncadd (%p2166_p9), %s1895_s10, 4294967168  ;;  %s19_s30 = sadd.s32 1, %s2364_s30   ;;  %s2966_s13 = sld [smem:[#allocation5_spill]] }
 0x357   : > { %p16_p10 = scmp.ge.s32.totalorder %s19_s30, 10   ;;  %s2967_s19 = sld [smem:[#allocation6_spill]] }
 0x358   : > { %s2968_s12 = sld [smem:[#allocation7_spill]]  ;;  %s2969_s21 = smov %s2332_s22 }
 0x359   : > { %s2970_s22 = smov %s2336_s23  ;;  %s2971_s23 = smov %s2488_s20 }
 0x35a   : > { %s2972_s24 = smov %s2352_s27  ;;  %s2973_s25 = smov %s2356_s28 }
 0x35b   : > { %s2974_s26 = smov %s2360_s29  ;;  %18 = sbr.rel (!%p16_p10) target bundleno = 9 (0x9), region = 87 }
 0x35c   : > { %s2975_s27 = smov %s2966_s13 }
 0x35d   : > { %s2976_s28 = smov %s2967_s19 }
 0x35e   : > { %s2977_s29 = smov %s2968_s12 }
 0x360   :  { %1900 = vsyncpa [#allocation3], 1 }
 0x361   :  { %1902 = vsyncpa [#allocation3 + $0x1], 1 }

</bundles_post_ra>
